<compile_context>
chip_gen: v7x
topology: tpu7x:2x2x1
jax: 0.10.0
libtpu: 0.0.40
codegen_flags: <defaults>
</compile_context>

<pallas_src>
import functools

import jax
import jax.numpy as jnp
from jax import lax
from jax.experimental import pallas as pl
from jax.experimental.pallas import tpu as pltpu

BN_EPS = 1e-5
LANES = 128


def _round_up(x, m):
    return (x + m - 1) // m * m


# ----------------------------------------------------------------------------
# Pallas kernels
# ----------------------------------------------------------------------------
def matmul_stats_kernel(p_ref, w_ref, z_ref, s_ref):
    """Pass 1: conv-as-matmul (bf16 MXU operands, f32 accumulate) + BN stats.

    p_ref: (TM, Kp)  bf16 im2col patch tile
    w_ref: (Kp, Cp)  bf16 weights (channel axis zero-padded to 128 lanes)
    z_ref: (TM, Cp)  f32 pre-BN conv output tile
    s_ref: (8,  Cp)  f32 per-tile stats: row 0 = sum, row 1 = sum of squares
    """
    z = jnp.dot(p_ref[...], w_ref[...], preferred_element_type=jnp.float32)
    z_ref[...] = z
    s1 = jnp.sum(z, axis=0, keepdims=True)        # (1, Cp)
    s2 = jnp.sum(z * z, axis=0, keepdims=True)    # (1, Cp)  single-pass stats
    row = lax.broadcasted_iota(jnp.int32, s_ref.shape, 0)
    s_ref[...] = jnp.where(row == 0, s1, jnp.where(row == 1, s2, 0.0))


def bn_relu_kernel(z_ref, sc_ref, sh_ref, o_ref):
    """Pass 2 (cross convs): y = relu(z * scale + shift)."""
    o_ref[...] = jnp.maximum(z_ref[...] * sc_ref[...] + sh_ref[...], 0.0)


def bn_relu_pool_kernel(z_ref, sc_ref, sh_ref, o_ref):
    """Pass 2 (down conv): BN + ReLU fused with the 2x2 / stride-2 max pool.

    z_ref: (2*TH, Wc, 2*Cp) -- consecutive row pairs are the two H-parities of
           one pooled output row; lanes [0:Cp] / [Cp:2Cp] are the two
           W-parities of the same channel (lane-aligned, no masked stores).
    sc_ref, sh_ref: (1, 2*Cp) scale / shift (per-channel values repeated twice)
    o_ref: (TH, Wc, Cp)
    """
    th, wc, cp = o_ref.shape
    y = jnp.maximum(z_ref[...] * sc_ref[...] + sh_ref[...], 0.0)  # BN + ReLU
    y = y.reshape(th, 2, wc, 2 * cp)                  # split H-parity (leading dim)
    v = jnp.maximum(y[:, 0], y[:, 1])                 # pool over H
    o_ref[...] = jnp.maximum(v[:, :, :cp], v[:, :, cp:])  # pool over W (lane slice)


# ----------------------------------------------------------------------------
# Wrappers (glue: im2col, padding, layout reshapes, pallas_call plumbing)
# ----------------------------------------------------------------------------
def _im2col(x_nhwc, kh, kw, pad):
    """x_nhwc: (N, H, W, C) -> patches (N*Ho*Wo, kh*kw*C), plus (N, Ho, Wo)."""
    xp = jnp.pad(x_nhwc, ((0, 0), (pad, pad), (pad, pad), (0, 0)))
    n, hp, wp, c = xp.shape
    ho, wo = hp - kh + 1, wp - kw + 1
    cols = []
    for i in range(kh):
        for j in range(kw):
            cols.append(xp[:, i:i + ho, j:j + wo, :])
    patches = jnp.stack(cols, axis=3).reshape(n * ho * wo, kh * kw * c)
    return patches, (n, ho, wo)


def conv_bn_relu_block(x_nhwc, weight_oihw, gamma, beta, padding, pool,
                       tile_m=256):
    """conv (no bias; it cancels) -> BN(train) -> ReLU [-> maxpool2x2]."""
    cout, cin, kh, kw = weight_oihw.shape
    # TODO(synk): fuse the kh*kw taps into the matmul kernel (shifted matmuls
    # accumulated in VMEM) so the im2col patch matrix never hits HBM at all.
    patches, (n, ho, wo) = _im2col(x_nhwc.astype(jnp.float32), kh, kw, padding)
    m, k = patches.shape
    kp = _round_up(k, 8)              # aligned K (sublane granularity)
    cp = _round_up(cout, LANES)       # lane-dense channel axis (>=128)
    tm = tile_m if m >= tile_m else _round_up(m, 8)
    m_pad = _round_up(m, tm)          # zero rows contribute 0 to sum / sum-sq
    num_m = m_pad // tm

    patches_p = jnp.pad(patches, ((0, m_pad - m), (0, kp - k))).astype(jnp.bfloat16)
    w2d = jnp.transpose(weight_oihw, (2, 3, 1, 0)).reshape(k, cout)
    w_p = jnp.pad(w2d, ((0, kp - k), (0, cp - cout))).astype(jnp.bfloat16)

    # Pass 1: row-tiled matmul + per-tile BN statistics.  Per-step footprint
    # (bf16 patch tile + resident weights + f32 z tile, double buffered) is a
    # few hundred KiB -> comfortably inside v7x's 64 MiB VMEM.
    z_pad, stats = pl.pallas_call(
        matmul_stats_kernel,
        grid=(num_m,),
        in_specs=[pl.BlockSpec((tm, kp), lambda i: (i, 0)),
                  pl.BlockSpec((kp, cp), lambda i: (0, 0))],
        out_specs=[pl.BlockSpec((tm, cp), lambda i: (i, 0)),
                   pl.BlockSpec((8, cp), lambda i: (i, 0))],
        out_shape=[jax.ShapeDtypeStruct((m_pad, cp), jnp.float32),
                   jax.ShapeDtypeStruct((num_m * 8, cp), jnp.float32)],
        compiler_params=pltpu.CompilerParams(dimension_semantics=("parallel",)),
    )(patches_p, w_p)

    # Tiny per-channel reduction + affine fold in plain JAX (global BN stats).
    tot = stats.reshape(num_m, 8, cp).sum(axis=0)
    mean = tot[0] / m
    var = jnp.maximum(tot[1] / m - mean * mean, 0.0)   # biased (training) var
    inv = lax.rsqrt(var + BN_EPS)
    g_p = jnp.pad(gamma.astype(jnp.float32), (0, cp - cout))
    b_p = jnp.pad(beta.astype(jnp.float32), (0, cp - cout))
    scale = (g_p * inv).reshape(1, cp)
    shift = (b_p - mean * g_p * inv).reshape(1, cp)

    if not pool:
        y_pad = pl.pallas_call(
            bn_relu_kernel,
            grid=(num_m,),
            in_specs=[pl.BlockSpec((tm, cp), lambda i: (i, 0)),
                      pl.BlockSpec((1, cp), lambda i: (0, 0)),
                      pl.BlockSpec((1, cp), lambda i: (0, 0))],
            out_specs=pl.BlockSpec((tm, cp), lambda i: (i, 0)),
            out_shape=jax.ShapeDtypeStruct((m_pad, cp), jnp.float32),
            compiler_params=pltpu.CompilerParams(dimension_semantics=("parallel",)),
        )(z_pad, scale, shift)
        return y_pad[:m].reshape(n, ho, wo, cp)[..., :cout]

    # Fused BN -> ReLU -> 2x2 maxpool.  The W-parity is folded into the lane
    # axis (last dim 2*Cp) and the H-parity is a pair of adjacent rows, so the
    # kernel only needs lane-aligned slices and elementwise maxima.
    assert ho % 2 == 0 and wo % 2 == 0, "maxpool2x2 needs even spatial dims"
    hc, wc = ho // 2, wo // 2
    rows_out = n * hc
    th = next(t for t in (64, 32, 16, 8, 4, 2, 1) if rows_out % t == 0)
    z3 = z_pad[:m].reshape(n * ho, wc, 2 * cp)        # free row-major reshape
    scale2 = jnp.concatenate([scale, scale], axis=1)
    shift2 = jnp.concatenate([shift, shift], axis=1)
    pooled = pl.pallas_call(
        bn_relu_pool_kernel,
        grid=(rows_out // th,),
        in_specs=[pl.BlockSpec((2 * th, wc, 2 * cp), lambda i: (i, 0, 0)),
                  pl.BlockSpec((1, 2 * cp), lambda i: (0, 0)),
                  pl.BlockSpec((1, 2 * cp), lambda i: (0, 0))],
        out_specs=pl.BlockSpec((th, wc, cp), lambda i: (i, 0, 0)),
        out_shape=jax.ShapeDtypeStruct((rows_out, wc, cp), jnp.float32),
        compiler_params=pltpu.CompilerParams(dimension_semantics=("parallel",)),
    )(z3, scale2, shift2)
    return pooled.reshape(n, hc, wc, cp)[..., :cout]


# ----------------------------------------------------------------------------
# DownLayer parameters + forward
# ----------------------------------------------------------------------------
def init_downlayer_params(key, in_channels, out_channels, kernel_size, cross_convs):
    keys = jax.random.split(key, 2 * (1 + cross_convs))

    def conv_init(kw_key, kb_key, cin, cout, ks):
        fan_in = cin * ks * ks
        bound = 1.0 / jnp.sqrt(jnp.float32(fan_in))
        w = jax.random.uniform(kw_key, (cout, cin, ks, ks), jnp.float32, -bound, bound)
        b = jax.random.uniform(kb_key, (cout,), jnp.float32, -bound, bound)
        return w, b

    return {
        "downConv": conv_init(keys[0], keys[1], in_channels, out_channels, kernel_size),
        "crossConvs": [
            conv_init(keys[2 + 2 * i], keys[3 + 2 * i], out_channels, out_channels, kernel_size)
            for i in range(cross_convs)
        ],
        # BatchNorm2d default init: gamma = 1, beta = 0 (training mode -> batch stats).
        "batchNorms": [
            (jnp.ones((out_channels,), jnp.float32), jnp.zeros((out_channels,), jnp.float32))
            for _ in range(1 + cross_convs)
        ],
    }


def downlayer_forward(params, x_nchw, padding):
    """Forward pass, NCHW in / NCHW out (PyTorch layout).

    The conv bias parameters are intentionally not used by the kernels: under
    training-mode BatchNorm the bias is added and then exactly removed by the
    batch mean (verified against the bias-including reference below).
    """
    x = jnp.transpose(x_nchw, (0, 2, 3, 1))  # NCHW -> NHWC
    w0, _ = params["downConv"]
    g0, be0 = params["batchNorms"][0]
    x = conv_bn_relu_block(x, w0, g0, be0, padding, pool=True)   # conv->BN->ReLU->pool
    for i, (wi, _) in enumerate(params["crossConvs"]):
        gi, bei = params["batchNorms"][i + 1]
        x = conv_bn_relu_block(x, wi, gi, bei, padding, pool=False)
    return jnp.transpose(x, (0, 3, 1, 2))  # NHWC -> NCHW


# ----------------------------------------------------------------------------
# Pure-JAX references for correctness checks
# ----------------------------------------------------------------------------
def _ref_conv_bn_relu(x_nhwc, w_oihw, b, g, beta, padding, quantize):
    if quantize:  # mirror the kernel's bf16 MXU operands (f32 accumulation)
        x_nhwc = x_nhwc.astype(jnp.bfloat16).astype(jnp.float32)
        w_oihw = w_oihw.astype(jnp.bfloat16).astype(jnp.float32)
    w_hwio = jnp.transpose(w_oihw, (2, 3, 1, 0))
    z = lax.conv_general_dilated(
        x_nhwc, w_hwio, window_strides=(1, 1),
        padding=[(padding, padding), (padding, padding)],
        dimension_numbers=("NHWC", "HWIO", "NHWC"),
    ) + b.reshape(1, 1, 1, -1)
    mean = jnp.mean(z, axis=(0, 1, 2), keepdims=True)
    var = jnp.mean((z - mean) ** 2, axis=(0, 1, 2), keepdims=True)
    y = (z - mean) * lax.rsqrt(var + BN_EPS) * g.reshape(1, 1, 1, -1) + beta.reshape(1, 1, 1, -1)
    return jnp.maximum(y, 0.0)


def _ref_forward(params, x_nchw, padding, quantize):
    x = jnp.transpose(x_nchw, (0, 2, 3, 1))
    w0, b0 = params["downConv"]
    g0, be0 = params["batchNorms"][0]
    x = _ref_conv_bn_relu(x, w0, b0, g0, be0, padding, quantize)
    n, h, w, c = x.shape
    x = jnp.max(x.reshape(n, h // 2, 2, w // 2, 2, c), axis=(2, 4))
    for i, (wi, bi) in enumerate(params["crossConvs"]):
        gi, bei = params["batchNorms"][i + 1]
        x = _ref_conv_bn_relu(x, wi, bi, gi, bei, padding, quantize)
    return jnp.transpose(x, (0, 3, 1, 2))


# ----------------------------------------------------------------------------
if __name__ == "__main__":
    # DownLayer(in_channels=4, out_channels=8, kernel_size=3, padding=1,
    #           cross_convs=2, activ=ReLU, pool=MaxPool2d(2))
    N, CIN, H, W = 2, 4, 16, 16
    COUT, KS, PAD, CROSS = 8, 3, 1, 2

    key = jax.random.PRNGKey(0)
    kx, kp = jax.random.split(key)
    x = jax.random.normal(kx, (N, CIN, H, W), jnp.float32)  # NCHW like PyTorch
    params = init_downlayer_params(kp, CIN, COUT, KS, CROSS)

    fwd = jax.jit(functools.partial(downlayer_forward, padding=PAD))
    out = jax.block_until_ready(fwd(params, x))
    assert out.shape == (N, COUT, H // 2, W // 2), out.shape

    # Exactness check against a reference that uses the same bf16 operand
    # quantization (isolates tiling / two-phase BN / pool-fusion correctness).
    ref_q = jax.block_until_ready(_ref_forward(params, x, PAD, quantize=True))
    err_q = float(jnp.max(jnp.abs(out - ref_q)))
    assert err_q < 5e-3, f"mismatch vs bf16-quantized reference: {err_q}"

    # Semantics check against the full-f32 PyTorch-style module (differences
    # come only from the bf16 MXU operands).
    ref_f = jax.block_until_ready(_ref_forward(params, x, PAD, quantize=False))
    err_f = float(jnp.max(jnp.abs(out - ref_f)))
    assert err_f < 1e-1, f"mismatch vs f32 reference: {err_f}"

    print("KERNEL_OK")
</pallas_src>

<mosaic_0001>
module attributes {stable_mosaic.version = 11 : i64} {
  func.func @matmul_stats_kernel(%arg0: i32, %arg1: memref<256x40xbf16, #tpu.memory_space<vmem>>, %arg2: memref<40x128xbf16, #tpu.memory_space<vmem>>, %arg3: memref<256x128xf32, #tpu.memory_space<vmem>>, %arg4: memref<8x128xf32, #tpu.memory_space<vmem>>) attributes {dimension_semantics = [#tpu.dimension_semantics<parallel>], iteration_bounds = array<i64: 2>, scalar_prefetch = 0 : i64, scratch_operands = 0 : i64, tpu.core_type = #tpu.core_type<tc>, window_params = [{transform_indices = @transform_0, window_bounds = array<i64: 256, 40>}, {pipeline_mode = #tpu.pipeline_mode<synchronous>, transform_indices = @transform_1, window_bounds = array<i64: 40, 128>}, {transform_indices = @transform_2, window_bounds = array<i64: 256, 128>}, {transform_indices = @transform_3, window_bounds = array<i64: 8, 128>}]} {
    %c0 = arith.constant 0 : index
    %c0_0 = arith.constant 0 : index
    %0 = vector.load %arg1[%c0, %c0_0] : memref<256x40xbf16, #tpu.memory_space<vmem>>, vector<256x40xbf16>
    %c0_1 = arith.constant 0 : index
    %c0_2 = arith.constant 0 : index
    %1 = vector.load %arg2[%c0_1, %c0_2] : memref<40x128xbf16, #tpu.memory_space<vmem>>, vector<40x128xbf16>
    %cst = arith.constant dense<0.000000e+00> : vector<256x128xf32>
    %2 = tpu.matmul %0, %1, %cst {dimension_numbers = #tpu.dot_dimension_numbers<[1], [0], [0], [1], [0, 0, 1, 1], [], []>} : vector<256x40xbf16>, vector<40x128xbf16>, vector<256x128xf32> -> vector<256x128xf32>
    %c0_3 = arith.constant 0 : index
    %c0_4 = arith.constant 0 : index
    %3 = vector.load %arg3[%c0_3, %c0_4] : memref<256x128xf32, #tpu.memory_space<vmem>>, vector<256x128xf32>
    tpu.vector_store %arg3[%c0_3, %c0_4], %2 {strides = array<i32>} : memref<256x128xf32, #tpu.memory_space<vmem>>, vector<256x128xf32>,
    %cst_5 = arith.constant dense<0.000000e+00> : vector<128xf32>
    %4 = vector.multi_reduction <add>, %2, %cst_5 [0] : vector<256x128xf32> to vector<128xf32>
    %5 = vector.shape_cast %4 : vector<128xf32> to vector<1x128xf32>
    %6 = arith.mulf %2, %2 : vector<256x128xf32>
    %cst_6 = arith.constant dense<0.000000e+00> : vector<128xf32>
    %7 = vector.multi_reduction <add>, %6, %cst_6 [0] : vector<256x128xf32> to vector<128xf32>
    %8 = vector.shape_cast %7 : vector<128xf32> to vector<1x128xf32>
    %9 = tpu.iota {dimensions = array<i32: 0>} : vector<8x128xi32>
    %c0_i32 = arith.constant 0 : i32
    %10 = vector.broadcast %c0_i32 : i32 to vector<8x128xi32>
    %11 = arith.cmpi eq, %9, %10 : vector<8x128xi32>
    %c1_i32 = arith.constant 1 : i32
    %12 = vector.broadcast %c1_i32 : i32 to vector<8x128xi32>
    %13 = arith.cmpi eq, %9, %12 : vector<8x128xi32>
    %cst_7 = arith.constant 0.000000e+00 : f32
    %14 = vector.shape_cast %8 : vector<1x128xf32> to vector<1x128xf32>
    %15 = vector.broadcast %14 : vector<1x128xf32> to vector<8x128xf32>
    %16 = vector.broadcast %cst_7 : f32 to vector<8x128xf32>
    %17 = arith.select %13, %15, %16 : vector<8x128xi1>, vector<8x128xf32>
    %18 = vector.shape_cast %5 : vector<1x128xf32> to vector<1x128xf32>
    %19 = vector.broadcast %18 : vector<1x128xf32> to vector<8x128xf32>
    %20 = arith.select %11, %19, %17 : vector<8x128xi1>, vector<8x128xf32>
    %c0_8 = arith.constant 0 : index
    %c0_9 = arith.constant 0 : index
    %21 = vector.load %arg4[%c0_8, %c0_9] : memref<8x128xf32, #tpu.memory_space<vmem>>, vector<8x128xf32>
    tpu.vector_store %arg4[%c0_8, %c0_9], %20 {strides = array<i32>} : memref<8x128xf32, #tpu.memory_space<vmem>>, vector<8x128xf32>,
    return
  }
  func.func @transform_0(%arg0: i32) -> (i32, i32) {
    %c0_i32 = arith.constant 0 : i32
    %c0_i32_0 = arith.constant 0 : i32
    return %arg0, %c0_i32 : i32, i32
  }
  func.func @transform_1(%arg0: i32) -> (i32, i32) {
    %c0_i32 = arith.constant 0 : i32
    %c0_i32_0 = arith.constant 0 : i32
    %c0_i32_1 = arith.constant 0 : i32
    return %c0_i32, %c0_i32_0 : i32, i32
  }
  func.func @transform_2(%arg0: i32) -> (i32, i32) {
    %c0_i32 = arith.constant 0 : i32
    %c0_i32_0 = arith.constant 0 : i32
    return %arg0, %c0_i32 : i32, i32
  }
  func.func @transform_3(%arg0: i32) -> (i32, i32) {
    %c0_i32 = arith.constant 0 : i32
    %c0_i32_0 = arith.constant 0 : i32
    return %arg0, %c0_i32 : i32, i32
  }
}

module attributes {stable_mosaic.version = 11 : i64} {
  func.func @bn_relu_pool_kernel(%arg0: i32, %arg1: memref<32x8x256xf32, #tpu.memory_space<vmem>>, %arg2: memref<1x256xf32, #tpu.memory_space<vmem>>, %arg3: memref<1x256xf32, #tpu.memory_space<vmem>>, %arg4: memref<16x8x128xf32, #tpu.memory_space<vmem>>) attributes {dimension_semantics = [#tpu.dimension_semantics<parallel>], iteration_bounds = array<i64: 1>, scalar_prefetch = 0 : i64, scratch_operands = 0 : i64, tpu.core_type = #tpu.core_type<tc>, window_params = [{transform_indices = @transform_0, window_bounds = array<i64: 32, 8, 256>}, {pipeline_mode = #tpu.pipeline_mode<synchronous>, transform_indices = @transform_1, window_bounds = array<i64: 1, 256>}, {pipeline_mode = #tpu.pipeline_mode<synchronous>, transform_indices = @transform_2, window_bounds = array<i64: 1, 256>}, {transform_indices = @transform_3, window_bounds = array<i64: 16, 8, 128>}]} {
    %c0 = arith.constant 0 : index
    %c0_0 = arith.constant 0 : index
    %c0_1 = arith.constant 0 : index
    %0 = vector.load %arg1[%c0, %c0_0, %c0_1] : memref<32x8x256xf32, #tpu.memory_space<vmem>>, vector<32x8x256xf32>
    %c0_2 = arith.constant 0 : index
    %c0_3 = arith.constant 0 : index
    %1 = vector.load %arg2[%c0_2, %c0_3] : memref<1x256xf32, #tpu.memory_space<vmem>>, vector<1x256xf32>
    %2 = vector.shape_cast %1 : vector<1x256xf32> to vector<1x1x256xf32>
    %3 = vector.broadcast %2 : vector<1x1x256xf32> to vector<32x8x256xf32>
    %4 = arith.mulf %0, %3 : vector<32x8x256xf32>
    %c0_4 = arith.constant 0 : index
    %c0_5 = arith.constant 0 : index
    %5 = vector.load %arg3[%c0_4, %c0_5] : memref<1x256xf32, #tpu.memory_space<vmem>>, vector<1x256xf32>
    %6 = vector.shape_cast %5 : vector<1x256xf32> to vector<1x1x256xf32>
    %7 = vector.broadcast %6 : vector<1x1x256xf32> to vector<32x8x256xf32>
    %8 = arith.addf %4, %7 : vector<32x8x256xf32>
    %cst = arith.constant 0.000000e+00 : f32
    %9 = vector.broadcast %cst : f32 to vector<32x8x256xf32>
    %10 = arith.maximumf %8, %9 : vector<32x8x256xf32>
    %11 = vector.shape_cast %10 : vector<32x8x256xf32> to vector<16x2x8x256xf32>
    %12 = vector.extract_strided_slice %11 {offsets = [0, 0, 0, 0], sizes = [16, 1, 8, 256], strides = [1, 1, 1, 1]} : vector<16x2x8x256xf32> to vector<16x1x8x256xf32>
    %13 = vector.shape_cast %12 : vector<16x1x8x256xf32> to vector<16x8x256xf32>
    %14 = vector.extract_strided_slice %11 {offsets = [0, 1, 0, 0], sizes = [16, 1, 8, 256], strides = [1, 1, 1, 1]} : vector<16x2x8x256xf32> to vector<16x1x8x256xf32>
    %15 = vector.shape_cast %14 : vector<16x1x8x256xf32> to vector<16x8x256xf32>
    %16 = arith.maximumf %13, %15 : vector<16x8x256xf32>
    %17 = vector.extract_strided_slice %16 {offsets = [0, 0, 0], sizes = [16, 8, 128], strides = [1, 1, 1]} : vector<16x8x256xf32> to vector<16x8x128xf32>
    %18 = vector.extract_strided_slice %16 {offsets = [0, 0, 128], sizes = [16, 8, 128], strides = [1, 1, 1]} : vector<16x8x256xf32> to vector<16x8x128xf32>
    %19 = arith.maximumf %17, %18 : vector<16x8x128xf32>
    %c0_6 = arith.constant 0 : index
    %c0_7 = arith.constant 0 : index
    %c0_8 = arith.constant 0 : index
    %20 = vector.load %arg4[%c0_6, %c0_7, %c0_8] : memref<16x8x128xf32, #tpu.memory_space<vmem>>, vector<16x8x128xf32>
    tpu.vector_store %arg4[%c0_6, %c0_7, %c0_8], %19 {strides = array<i32>} : memref<16x8x128xf32, #tpu.memory_space<vmem>>, vector<16x8x128xf32>,
    return
  }
  func.func @transform_0(%arg0: i32) -> (i32, i32, i32) {
    %c0_i32 = arith.constant 0 : i32
    %c0_i32_0 = arith.constant 0 : i32
    %c0_i32_1 = arith.constant 0 : i32
    return %arg0, %c0_i32, %c0_i32_0 : i32, i32, i32
  }
  func.func @transform_1(%arg0: i32) -> (i32, i32) {
    %c0_i32 = arith.constant 0 : i32
    %c0_i32_0 = arith.constant 0 : i32
    %c0_i32_1 = arith.constant 0 : i32
    return %c0_i32, %c0_i32_0 : i32, i32
  }
  func.func @transform_2(%arg0: i32) -> (i32, i32) {
    %c0_i32 = arith.constant 0 : i32
    %c0_i32_0 = arith.constant 0 : i32
    %c0_i32_1 = arith.constant 0 : i32
    return %c0_i32, %c0_i32_0 : i32, i32
  }
  func.func @transform_3(%arg0: i32) -> (i32, i32, i32) {
    %c0_i32 = arith.constant 0 : i32
    %c0_i32_0 = arith.constant 0 : i32
    %c0_i32_1 = arith.constant 0 : i32
    return %arg0, %c0_i32, %c0_i32_0 : i32, i32, i32
  }
}

module attributes {stable_mosaic.version = 11 : i64} {
  func.func @matmul_stats_kernel(%arg0: i32, %arg1: memref<128x72xbf16, #tpu.memory_space<vmem>>, %arg2: memref<72x128xbf16, #tpu.memory_space<vmem>>, %arg3: memref<128x128xf32, #tpu.memory_space<vmem>>, %arg4: memref<8x128xf32, #tpu.memory_space<vmem>>) attributes {dimension_semantics = [#tpu.dimension_semantics<parallel>], iteration_bounds = array<i64: 1>, scalar_prefetch = 0 : i64, scratch_operands = 0 : i64, tpu.core_type = #tpu.core_type<tc>, window_params = [{transform_indices = @transform_0, window_bounds = array<i64: 128, 72>}, {pipeline_mode = #tpu.pipeline_mode<synchronous>, transform_indices = @transform_1, window_bounds = array<i64: 72, 128>}, {transform_indices = @transform_2, window_bounds = array<i64: 128, 128>}, {transform_indices = @transform_3, window_bounds = array<i64: 8, 128>}]} {
    %c0 = arith.constant 0 : index
    %c0_0 = arith.constant 0 : index
    %0 = vector.load %arg1[%c0, %c0_0] : memref<128x72xbf16, #tpu.memory_space<vmem>>, vector<128x72xbf16>
    %c0_1 = arith.constant 0 : index
    %c0_2 = arith.constant 0 : index
    %1 = vector.load %arg2[%c0_1, %c0_2] : memref<72x128xbf16, #tpu.memory_space<vmem>>, vector<72x128xbf16>
    %cst = arith.constant dense<0.000000e+00> : vector<128x128xf32>
    %2 = tpu.matmul %0, %1, %cst {dimension_numbers = #tpu.dot_dimension_numbers<[1], [0], [0], [1], [0, 0, 1, 1], [], []>} : vector<128x72xbf16>, vector<72x128xbf16>, vector<128x128xf32> -> vector<128x128xf32>
    %c0_3 = arith.constant 0 : index
    %c0_4 = arith.constant 0 : index
    %3 = vector.load %arg3[%c0_3, %c0_4] : memref<128x128xf32, #tpu.memory_space<vmem>>, vector<128x128xf32>
    tpu.vector_store %arg3[%c0_3, %c0_4], %2 {strides = array<i32>} : memref<128x128xf32, #tpu.memory_space<vmem>>, vector<128x128xf32>,
    %cst_5 = arith.constant dense<0.000000e+00> : vector<128xf32>
    %4 = vector.multi_reduction <add>, %2, %cst_5 [0] : vector<128x128xf32> to vector<128xf32>
    %5 = vector.shape_cast %4 : vector<128xf32> to vector<1x128xf32>
    %6 = arith.mulf %2, %2 : vector<128x128xf32>
    %cst_6 = arith.constant dense<0.000000e+00> : vector<128xf32>
    %7 = vector.multi_reduction <add>, %6, %cst_6 [0] : vector<128x128xf32> to vector<128xf32>
    %8 = vector.shape_cast %7 : vector<128xf32> to vector<1x128xf32>
    %9 = tpu.iota {dimensions = array<i32: 0>} : vector<8x128xi32>
    %c0_i32 = arith.constant 0 : i32
    %10 = vector.broadcast %c0_i32 : i32 to vector<8x128xi32>
    %11 = arith.cmpi eq, %9, %10 : vector<8x128xi32>
    %c1_i32 = arith.constant 1 : i32
    %12 = vector.broadcast %c1_i32 : i32 to vector<8x128xi32>
    %13 = arith.cmpi eq, %9, %12 : vector<8x128xi32>
    %cst_7 = arith.constant 0.000000e+00 : f32
    %14 = vector.shape_cast %8 : vector<1x128xf32> to vector<1x128xf32>
    %15 = vector.broadcast %14 : vector<1x128xf32> to vector<8x128xf32>
    %16 = vector.broadcast %cst_7 : f32 to vector<8x128xf32>
    %17 = arith.select %13, %15, %16 : vector<8x128xi1>, vector<8x128xf32>
    %18 = vector.shape_cast %5 : vector<1x128xf32> to vector<1x128xf32>
    %19 = vector.broadcast %18 : vector<1x128xf32> to vector<8x128xf32>
    %20 = arith.select %11, %19, %17 : vector<8x128xi1>, vector<8x128xf32>
    %c0_8 = arith.constant 0 : index
    %c0_9 = arith.constant 0 : index
    %21 = vector.load %arg4[%c0_8, %c0_9] : memref<8x128xf32, #tpu.memory_space<vmem>>, vector<8x128xf32>
    tpu.vector_store %arg4[%c0_8, %c0_9], %20 {strides = array<i32>} : memref<8x128xf32, #tpu.memory_space<vmem>>, vector<8x128xf32>,
    return
  }
  func.func @transform_0(%arg0: i32) -> (i32, i32) {
    %c0_i32 = arith.constant 0 : i32
    %c0_i32_0 = arith.constant 0 : i32
    return %arg0, %c0_i32 : i32, i32
  }
  func.func @transform_1(%arg0: i32) -> (i32, i32) {
    %c0_i32 = arith.constant 0 : i32
    %c0_i32_0 = arith.constant 0 : i32
    %c0_i32_1 = arith.constant 0 : i32
    return %c0_i32, %c0_i32_0 : i32, i32
  }
  func.func @transform_2(%arg0: i32) -> (i32, i32) {
    %c0_i32 = arith.constant 0 : i32
    %c0_i32_0 = arith.constant 0 : i32
    return %arg0, %c0_i32 : i32, i32
  }
  func.func @transform_3(%arg0: i32) -> (i32, i32) {
    %c0_i32 = arith.constant 0 : i32
    %c0_i32_0 = arith.constant 0 : i32
    return %arg0, %c0_i32 : i32, i32
  }
}

module attributes {stable_mosaic.version = 11 : i64} {
  func.func @bn_relu_kernel(%arg0: i32, %arg1: memref<128x128xf32, #tpu.memory_space<vmem>>, %arg2: memref<1x128xf32, #tpu.memory_space<vmem>>, %arg3: memref<1x128xf32, #tpu.memory_space<vmem>>, %arg4: memref<128x128xf32, #tpu.memory_space<vmem>>) attributes {dimension_semantics = [#tpu.dimension_semantics<parallel>], iteration_bounds = array<i64: 1>, scalar_prefetch = 0 : i64, scratch_operands = 0 : i64, tpu.core_type = #tpu.core_type<tc>, window_params = [{transform_indices = @transform_0, window_bounds = array<i64: 128, 128>}, {pipeline_mode = #tpu.pipeline_mode<synchronous>, transform_indices = @transform_1, window_bounds = array<i64: 1, 128>}, {pipeline_mode = #tpu.pipeline_mode<synchronous>, transform_indices = @transform_2, window_bounds = array<i64: 1, 128>}, {transform_indices = @transform_3, window_bounds = array<i64: 128, 128>}]} {
    %c0 = arith.constant 0 : index
    %c0_0 = arith.constant 0 : index
    %0 = vector.load %arg1[%c0, %c0_0] : memref<128x128xf32, #tpu.memory_space<vmem>>, vector<128x128xf32>
    %c0_1 = arith.constant 0 : index
    %c0_2 = arith.constant 0 : index
    %1 = vector.load %arg2[%c0_1, %c0_2] : memref<1x128xf32, #tpu.memory_space<vmem>>, vector<1x128xf32>
    %2 = vector.broadcast %1 : vector<1x128xf32> to vector<128x128xf32>
    %3 = arith.mulf %0, %2 : vector<128x128xf32>
    %c0_3 = arith.constant 0 : index
    %c0_4 = arith.constant 0 : index
    %4 = vector.load %arg3[%c0_3, %c0_4] : memref<1x128xf32, #tpu.memory_space<vmem>>, vector<1x128xf32>
    %5 = vector.broadcast %4 : vector<1x128xf32> to vector<128x128xf32>
    %6 = arith.addf %3, %5 : vector<128x128xf32>
    %cst = arith.constant 0.000000e+00 : f32
    %7 = vector.broadcast %cst : f32 to vector<128x128xf32>
    %8 = arith.maximumf %6, %7 : vector<128x128xf32>
    %c0_5 = arith.constant 0 : index
    %c0_6 = arith.constant 0 : index
    %9 = vector.load %arg4[%c0_5, %c0_6] : memref<128x128xf32, #tpu.memory_space<vmem>>, vector<128x128xf32>
    tpu.vector_store %arg4[%c0_5, %c0_6], %8 {strides = array<i32>} : memref<128x128xf32, #tpu.memory_space<vmem>>, vector<128x128xf32>,
    return
  }
  func.func @transform_0(%arg0: i32) -> (i32, i32) {
    %c0_i32 = arith.constant 0 : i32
    %c0_i32_0 = arith.constant 0 : i32
    return %arg0, %c0_i32 : i32, i32
  }
  func.func @transform_1(%arg0: i32) -> (i32, i32) {
    %c0_i32 = arith.constant 0 : i32
    %c0_i32_0 = arith.constant 0 : i32
    %c0_i32_1 = arith.constant 0 : i32
    return %c0_i32, %c0_i32_0 : i32, i32
  }
  func.func @transform_2(%arg0: i32) -> (i32, i32) {
    %c0_i32 = arith.constant 0 : i32
    %c0_i32_0 = arith.constant 0 : i32
    %c0_i32_1 = arith.constant 0 : i32
    return %c0_i32, %c0_i32_0 : i32, i32
  }
  func.func @transform_3(%arg0: i32) -> (i32, i32) {
    %c0_i32 = arith.constant 0 : i32
    %c0_i32_0 = arith.constant 0 : i32
    return %arg0, %c0_i32 : i32, i32
  }
}

</mosaic_0001>

<bundles_post_ra>
// kernel: downlayer_forward.7
= control target key start
LH: loop header
LB: loop body
LE: loop exit
PB: predicated region body
PF: predicated region fallthrough
CT: control target
= control target key end

     0   :  { %v80_v0 = vlaneseq  ;;  %s764_s1 = inlined_call_operand.vmem [shape: f32[1,256], index: 1, kind: input, shape index: {}]   ;;  %s765_s2 = inlined_call_operand.vmem [shape: f32[1,256], index: 2, kind: input, shape index: {}]   ;;  %s766_s0 = inlined_call_operand.vmem [shape: f32[32,8,256], index: 0, kind: input, shape index: {}]   ;;  %s767_s3 = inlined_call_operand.vmem [shape: f32[16,8,128], index: 3, kind: output, shape index: {}]  }
   0x1   :  { %v78_v2 = vld [vmem:[%s764_s1] sm:$0x3]  ;;  %v15_v5 = vld [vmem:[%s766_s0 + $0x8] sm:$0xff]  ;;  %v16_v8 = vld [vmem:[%s766_s0 + $0x10] sm:$0xff] }
   0x2   :  { %v81_v1 = vshrl.u32 %v80_v0, 7  ;;  %v154_v3 = vld [vmem:[%s765_s2] sm:$0x3]  ;;  %v17_v9 = vld [vmem:[%s766_s0 + $0x18] sm:$0xff]  ;;  %v19_v15 = vld [vmem:[%s766_s0 + $0x28] sm:$0xff] }
   0x3   :  { %v14_v4 = vld [vmem:[%s766_s0] sm:$0xff]  ;;  %v20_v16 = vld [vmem:[%s766_s0 + $0x30] sm:$0xff]  ;;  %v21_v17 = vld [vmem:[%s766_s0 + $0x38] sm:$0xff] }
   0x4   :  { %v82_v6 = vsub.s32 0, %v81_v1  ;;  %v86_v7 = vsub.s32 1, %v81_v1  ;;  %v18_v10 = vld [vmem:[%s766_s0 + $0x20] sm:$0xff]  ;;  %v23_v35 = vld [vmem:[%s766_s0 + $0x48] sm:$0xff]  ;;  %v24_v40 = vld [vmem:[%s766_s0 + $0x50] sm:$0xff] }
   0x5   :  { %v22_v34 = vld [vmem:[%s766_s0 + $0x40] sm:$0xff]  ;;  %v25_v41 = vld [vmem:[%s766_s0 + $0x58] sm:$0xff]  ;;  %v27_v51 = vld [vmem:[%s766_s0 + $0x68] sm:$0xff] }
   0x6   :  { %v403_v11 = vrot.slane %v78_v2, %v82_v6  ;;  %v405_v12 = vrot.slane %v78_v2, %v86_v7  ;;  %v407_v13 = vrot.slane %v154_v3, %v82_v6  ;;  %v409_v14 = vrot.slane %v154_v3, %v86_v7  ;;  %v26_v46 = vld [vmem:[%s766_s0 + $0x60] sm:$0xff]  ;;  %v28_v56 = vld [vmem:[%s766_s0 + $0x70] sm:$0xff]  ;;  %v29_v57 = vld [vmem:[%s766_s0 + $0x78] sm:$0xff] }
   0x7   :  { %v30_v2 = vld [vmem:[%s766_s0 + $0x80] sm:$0xff]  ;;  %v31_v3 = vld [vmem:[%s766_s0 + $0x88] sm:$0xff] }
   0x8   :  { %v90_v18 = vmul.f32 %v403_v11, %v14_v4  ;;  %v91_v19 = vmul.f32 %v405_v12, %v15_v5  ;;  %v92_v20 = vmul.f32 %v403_v11, %v16_v8  ;;  %v93_v21 = vmul.f32 %v405_v12, %v17_v9 }
   0x9   :  { %v94_v22 = vmul.f32 %v403_v11, %v18_v10  ;;  %v95_v23 = vmul.f32 %v405_v12, %v19_v15  ;;  %v96_v24 = vmul.f32 %v403_v11, %v20_v16  ;;  %v97_v25 = vmul.f32 %v405_v12, %v21_v17  ;;  %v32_v16 = vld [vmem:[%s766_s0 + $0x90] sm:$0xff]  ;;  %v33_v17 = vld [vmem:[%s766_s0 + $0x98] sm:$0xff] }
   0xa   :  { %v166_v26 = vadd.f32 %v407_v13, %v90_v18  ;;  %v167_v27 = vadd.f32 %v409_v14, %v91_v19  ;;  %v168_v28 = vadd.f32 %v407_v13, %v92_v20  ;;  %v169_v29 = vadd.f32 %v409_v14, %v93_v21 }
   0xb   :  { %v170_v30 = vadd.f32 %v407_v13, %v94_v22  ;;  %v171_v31 = vadd.f32 %v409_v14, %v95_v23  ;;  %v172_v32 = vadd.f32 %v407_v13, %v96_v24  ;;  %v173_v33 = vadd.f32 %v409_v14, %v97_v25  ;;  %v34_v22 = vld [vmem:[%s766_s0 + $0xa0] sm:$0xff] }
   0xc   :  { %v230_v36 = vmax.f32 %v166_v26, 0.0  ;;  %v231_v37 = vmax.f32 %v167_v27, 0.0  ;;  %v232_v38 = vmax.f32 %v168_v28, 0.0  ;;  %v233_v39 = vmax.f32 %v169_v29, 0.0 }
   0xd   :  { %v234_v42 = vmax.f32 %v170_v30, 0.0  ;;  %v235_v43 = vmax.f32 %v171_v31, 0.0  ;;  %v236_v44 = vmax.f32 %v172_v32, 0.0  ;;  %v237_v45 = vmax.f32 %v173_v33, 0.0  ;;  %v35_v31 = vld [vmem:[%s766_s0 + $0xa8] sm:$0xff]  ;;  %v36_v32 = vld [vmem:[%s766_s0 + $0xb0] sm:$0xff] }
   0xe   :  { %v294_v47 = vmax.f32 %v230_v36, %v232_v38  ;;  %v295_v48 = vmax.f32 %v231_v37, %v233_v39  ;;  %v98_v49 = vmul.f32 %v403_v11, %v22_v34  ;;  %v99_v50 = vmul.f32 %v405_v12, %v23_v35  ;;  %v37_v36 = vld [vmem:[%s766_s0 + $0xb8] sm:$0xff] }
   0xf   :  { %v296_v52 = vmax.f32 %v234_v42, %v236_v44  ;;  %v297_v53 = vmax.f32 %v235_v43, %v237_v45  ;;  %v100_v54 = vmul.f32 %v403_v11, %v24_v40  ;;  %v101_v55 = vmul.f32 %v405_v12, %v25_v41  ;;  %v38_v42 = vld [vmem:[%s766_s0 + $0xc0] sm:$0xff] }
  0x10   :  { %v326_v58 = vmax.f32 %v294_v47, %v295_v48  ;;  %v174_v59 = vadd.f32 %v407_v13, %v98_v49  ;;  %v175_v60 = vadd.f32 %v409_v14, %v99_v50  ;;  %v102_v61 = vmul.f32 %v403_v11, %v26_v46  ;;  %v39_v47 = vld [vmem:[%s766_s0 + $0xc8] sm:$0xff] }
  0x11   :  { %v327_v62 = vmax.f32 %v296_v52, %v297_v53  ;;  %v176_v63 = vadd.f32 %v407_v13, %v100_v54  ;;  %v177_v0 = vadd.f32 %v409_v14, %v101_v55  ;;  %v103_v1 = vmul.f32 %v405_v12, %v27_v51  ;;  %v40_v52 = vld [vmem:[%s766_s0 + $0xd0] sm:$0xff] }
  0x12   :  { %342 = vst [vmem:[%s767_s3] sm:$0xff] %v326_v58  ;;  %v238_v4 = vmax.f32 %v174_v59, 0.0  ;;  %v239_v5 = vmax.f32 %v175_v60, 0.0  ;;  %v104_v6 = vmul.f32 %v403_v11, %v28_v56  ;;  %v105_v7 = vmul.f32 %v405_v12, %v29_v57  ;;  %v41_v56 = vld [vmem:[%s766_s0 + $0xd8] sm:$0xff] }
  0x13   :  { %343 = vst [vmem:[%s767_s3 + $0x8] sm:$0xff] %v327_v62  ;;  %v240_v8 = vmax.f32 %v176_v63, 0.0  ;;  %v241_v9 = vmax.f32 %v177_v0, 0.0  ;;  %v178_v10 = vadd.f32 %v407_v13, %v102_v61  ;;  %v179_v15 = vadd.f32 %v409_v14, %v103_v1  ;;  %v42_v62 = vld [vmem:[%s766_s0 + $0xe0] sm:$0xff] }
  0x14   :  { %v180_v18 = vadd.f32 %v407_v13, %v104_v6  ;;  %v181_v19 = vadd.f32 %v409_v14, %v105_v7  ;;  %v106_v20 = vmul.f32 %v403_v11, %v30_v2  ;;  %v107_v21 = vmul.f32 %v405_v12, %v31_v3  ;;  %v43_v3 = vld [vmem:[%s766_s0 + $0xe8] sm:$0xff] }
  0x15   :  { %v298_v23 = vmax.f32 %v238_v4, %v240_v8  ;;  %v299_v24 = vmax.f32 %v239_v5, %v241_v9  ;;  %v242_v25 = vmax.f32 %v178_v10, 0.0  ;;  %v243_v26 = vmax.f32 %v179_v15, 0.0  ;;  %v44_v8 = vld [vmem:[%s766_s0 + $0xf0] sm:$0xff]  ;;  %v45_v9 = vld [vmem:[%s766_s0 + $0xf8] sm:$0xff] }
  0x16   :  { %v244_v27 = vmax.f32 %v180_v18, 0.0  ;;  %v245_v28 = vmax.f32 %v181_v19, 0.0  ;;  %v108_v29 = vmul.f32 %v403_v11, %v32_v16  ;;  %v109_v30 = vmul.f32 %v405_v12, %v33_v17 }
  0x17   :  { %v328_v33 = vmax.f32 %v298_v23, %v299_v24  ;;  %v182_v34 = vadd.f32 %v407_v13, %v106_v20  ;;  %v183_v35 = vadd.f32 %v409_v14, %v107_v21  ;;  %v110_v37 = vmul.f32 %v403_v11, %v34_v22  ;;  %v46_v22 = vld [vmem:[%s766_s0 + $0x100] sm:$0xff] }
  0x18   :  { %v300_v38 = vmax.f32 %v242_v25, %v244_v27  ;;  %v301_v39 = vmax.f32 %v243_v26, %v245_v28  ;;  %v184_v40 = vadd.f32 %v407_v13, %v108_v29  ;;  %v185_v41 = vadd.f32 %v409_v14, %v109_v30  ;;  %v47_v27 = vld [vmem:[%s766_s0 + $0x108] sm:$0xff] }
  0x19   :  { %344 = vst [vmem:[%s767_s3 + $0x10] sm:$0xff] %v328_v33  ;;  %v246_v43 = vmax.f32 %v182_v34, 0.0  ;;  %v247_v44 = vmax.f32 %v183_v35, 0.0  ;;  %v111_v45 = vmul.f32 %v405_v12, %v35_v31  ;;  %v112_v46 = vmul.f32 %v403_v11, %v36_v32  ;;  %v48_v32 = vld [vmem:[%s766_s0 + $0x110] sm:$0xff]  ;;  %v49_v33 = vld [vmem:[%s766_s0 + $0x118] sm:$0xff] }
  0x1a   :  { %v329_v48 = vmax.f32 %v300_v38, %v301_v39  ;;  %v248_v49 = vmax.f32 %v184_v40, 0.0  ;;  %v249_v50 = vmax.f32 %v185_v41, 0.0  ;;  %v113_v51 = vmul.f32 %v405_v12, %v37_v36  ;;  %v50_v38 = vld [vmem:[%s766_s0 + $0x120] sm:$0xff] }
  0x1b   :  { %v186_v53 = vadd.f32 %v407_v13, %v110_v37  ;;  %v187_v54 = vadd.f32 %v409_v14, %v111_v45  ;;  %v188_v55 = vadd.f32 %v407_v13, %v112_v46  ;;  %v114_v57 = vmul.f32 %v403_v11, %v38_v42 }
  0x1c   :  { %345 = vst [vmem:[%s767_s3 + $0x18] sm:$0xff] %v329_v48  ;;  %v302_v58 = vmax.f32 %v246_v43, %v248_v49  ;;  %v303_v59 = vmax.f32 %v247_v44, %v249_v50  ;;  %v189_v60 = vadd.f32 %v409_v14, %v113_v51  ;;  %v115_v61 = vmul.f32 %v405_v12, %v39_v47  ;;  %v51_v47 = vld [vmem:[%s766_s0 + $0x128] sm:$0xff]  ;;  %v52_v48 = vld [vmem:[%s766_s0 + $0x130] sm:$0xff] }
  0x1d   :  { %v250_v63 = vmax.f32 %v186_v53, 0.0  ;;  %v251_v0 = vmax.f32 %v187_v54, 0.0  ;;  %v252_v1 = vmax.f32 %v188_v55, 0.0  ;;  %v116_v2 = vmul.f32 %v403_v11, %v40_v52  ;;  %v53_v52 = vld [vmem:[%s766_s0 + $0x138] sm:$0xff] }
  0x1e   :  { %v330_v4 = vmax.f32 %v302_v58, %v303_v59  ;;  %v253_v5 = vmax.f32 %v189_v60, 0.0  ;;  %v117_v6 = vmul.f32 %v405_v12, %v41_v56  ;;  %v190_v7 = vadd.f32 %v407_v13, %v114_v57  ;;  %v54_v58 = vld [vmem:[%s766_s0 + $0x140] sm:$0xff] }
  0x1f   :  { %v304_v10 = vmax.f32 %v250_v63, %v252_v1  ;;  %v191_v15 = vadd.f32 %v409_v14, %v115_v61  ;;  %v192_v16 = vadd.f32 %v407_v13, %v116_v2  ;;  %v118_v17 = vmul.f32 %v403_v11, %v42_v62  ;;  %v55_v63 = vld [vmem:[%s766_s0 + $0x148] sm:$0xff] }
  0x20   :  { %346 = vst [vmem:[%s767_s3 + $0x20] sm:$0xff] %v330_v4  ;;  %v305_v18 = vmax.f32 %v251_v0, %v253_v5  ;;  %v193_v19 = vadd.f32 %v409_v14, %v117_v6  ;;  %v254_v20 = vmax.f32 %v190_v7, 0.0  ;;  %v119_v21 = vmul.f32 %v405_v12, %v43_v3  ;;  %v56_v4 = vld [vmem:[%s766_s0 + $0x150] sm:$0xff] }
  0x21   :  { %v255_v23 = vmax.f32 %v191_v15, 0.0  ;;  %v256_v24 = vmax.f32 %v192_v16, 0.0  ;;  %v120_v25 = vmul.f32 %v403_v11, %v44_v8  ;;  %v121_v26 = vmul.f32 %v405_v12, %v45_v9  ;;  %v57_v8 = vld [vmem:[%s766_s0 + $0x158] sm:$0xff] }
  0x22   :  { %v331_v28 = vmax.f32 %v304_v10, %v305_v18  ;;  %v257_v29 = vmax.f32 %v193_v19, 0.0  ;;  %v194_v30 = vadd.f32 %v407_v13, %v118_v17  ;;  %v195_v31 = vadd.f32 %v409_v14, %v119_v21  ;;  %v58_v18 = vld [vmem:[%s766_s0 + $0x160] sm:$0xff] }
  0x23   :  { %v306_v34 = vmax.f32 %v254_v20, %v256_v24  ;;  %v196_v35 = vadd.f32 %v407_v13, %v120_v25  ;;  %v197_v36 = vadd.f32 %v409_v14, %v121_v26  ;;  %v122_v37 = vmul.f32 %v403_v11, %v46_v22 }
  0x24   :  { %347 = vst [vmem:[%s767_s3 + $0x28] sm:$0xff] %v331_v28  ;;  %v307_v39 = vmax.f32 %v255_v23, %v257_v29  ;;  %v258_v40 = vmax.f32 %v194_v30, 0.0  ;;  %v259_v41 = vmax.f32 %v195_v31, 0.0  ;;  %v123_v42 = vmul.f32 %v405_v12, %v47_v27  ;;  %v59_v23 = vld [vmem:[%s766_s0 + $0x168] sm:$0xff]  ;;  %v60_v28 = vld [vmem:[%s766_s0 + $0x170] sm:$0xff]  ;;  %v61_v29 = vld [vmem:[%s766_s0 + $0x178] sm:$0xff] }
  0x25   :  { %v260_v43 = vmax.f32 %v196_v35, 0.0  ;;  %v261_v44 = vmax.f32 %v197_v36, 0.0  ;;  %v124_v45 = vmul.f32 %v403_v11, %v48_v32  ;;  %v125_v46 = vmul.f32 %v405_v12, %v49_v33 }
  0x26   :  { %v332_v49 = vmax.f32 %v306_v34, %v307_v39  ;;  %v198_v50 = vadd.f32 %v407_v13, %v122_v37  ;;  %v199_v51 = vadd.f32 %v409_v14, %v123_v42  ;;  %v126_v53 = vmul.f32 %v403_v11, %v50_v38  ;;  %v62_v38 = vld [vmem:[%s766_s0 + $0x180] sm:$0xff] }
  0x27   :  { %v308_v54 = vmax.f32 %v258_v40, %v260_v43  ;;  %v309_v55 = vmax.f32 %v259_v41, %v261_v44  ;;  %v200_v56 = vadd.f32 %v407_v13, %v124_v45  ;;  %v201_v57 = vadd.f32 %v409_v14, %v125_v46  ;;  %v63_v43 = vld [vmem:[%s766_s0 + $0x188] sm:$0xff] }
  0x28   :  { %348 = vst [vmem:[%s767_s3 + $0x30] sm:$0xff] %v332_v49  ;;  %v262_v59 = vmax.f32 %v198_v50, 0.0  ;;  %v263_v60 = vmax.f32 %v199_v51, 0.0  ;;  %v127_v61 = vmul.f32 %v405_v12, %v51_v47  ;;  %v128_v62 = vmul.f32 %v403_v11, %v52_v48  ;;  %v64_v48 = vld [vmem:[%s766_s0 + $0x190] sm:$0xff]  ;;  %v65_v49 = vld [vmem:[%s766_s0 + $0x198] sm:$0xff] }
  0x29   :  { %v333_v0 = vmax.f32 %v308_v54, %v309_v55  ;;  %v264_v1 = vmax.f32 %v200_v56, 0.0  ;;  %v265_v2 = vmax.f32 %v201_v57, 0.0  ;;  %v129_v3 = vmul.f32 %v405_v12, %v53_v52  ;;  %v66_v54 = vld [vmem:[%s766_s0 + $0x1a0] sm:$0xff] }
  0x2a   :  { %v202_v5 = vadd.f32 %v407_v13, %v126_v53  ;;  %v203_v6 = vadd.f32 %v409_v14, %v127_v61  ;;  %v204_v7 = vadd.f32 %v407_v13, %v128_v62  ;;  %v130_v9 = vmul.f32 %v403_v11, %v54_v58 }
  0x2b   :  { %349 = vst [vmem:[%s767_s3 + $0x38] sm:$0xff] %v333_v0  ;;  %v310_v10 = vmax.f32 %v262_v59, %v264_v1  ;;  %v311_v15 = vmax.f32 %v263_v60, %v265_v2  ;;  %v205_v16 = vadd.f32 %v409_v14, %v129_v3  ;;  %v131_v17 = vmul.f32 %v405_v12, %v55_v63  ;;  %v67_v63 = vld [vmem:[%s766_s0 + $0x1a8] sm:$0xff]  ;;  %v68_v0 = vld [vmem:[%s766_s0 + $0x1b0] sm:$0xff] }
  0x2c   :  { %v266_v19 = vmax.f32 %v202_v5, 0.0  ;;  %v267_v20 = vmax.f32 %v203_v6, 0.0  ;;  %v268_v21 = vmax.f32 %v204_v7, 0.0  ;;  %v132_v22 = vmul.f32 %v403_v11, %v56_v4  ;;  %v69_v4 = vld [vmem:[%s766_s0 + $0x1b8] sm:$0xff] }
  0x2d   :  { %v334_v24 = vmax.f32 %v310_v10, %v311_v15  ;;  %v269_v25 = vmax.f32 %v205_v16, 0.0  ;;  %v133_v26 = vmul.f32 %v405_v12, %v57_v8  ;;  %v206_v27 = vadd.f32 %v407_v13, %v130_v9  ;;  %v70_v10 = vld [vmem:[%s766_s0 + $0x1c0] sm:$0xff] }
  0x2e   :  { %v312_v30 = vmax.f32 %v266_v19, %v268_v21  ;;  %v207_v31 = vadd.f32 %v409_v14, %v131_v17  ;;  %v208_v32 = vadd.f32 %v407_v13, %v132_v22  ;;  %v134_v33 = vmul.f32 %v403_v11, %v58_v18  ;;  %v71_v19 = vld [vmem:[%s766_s0 + $0x1c8] sm:$0xff] }
  0x2f   :  { %350 = vst [vmem:[%s767_s3 + $0x40] sm:$0xff] %v334_v24  ;;  %v313_v34 = vmax.f32 %v267_v20, %v269_v25  ;;  %v209_v35 = vadd.f32 %v409_v14, %v133_v26  ;;  %v270_v36 = vmax.f32 %v206_v27, 0.0  ;;  %v135_v37 = vmul.f32 %v405_v12, %v59_v23  ;;  %v72_v24 = vld [vmem:[%s766_s0 + $0x1d0] sm:$0xff] }
  0x30   :  { %v271_v39 = vmax.f32 %v207_v31, 0.0  ;;  %v272_v40 = vmax.f32 %v208_v32, 0.0  ;;  %v136_v41 = vmul.f32 %v403_v11, %v60_v28  ;;  %v137_v42 = vmul.f32 %v405_v12, %v61_v29  ;;  %v73_v28 = vld [vmem:[%s766_s0 + $0x1d8] sm:$0xff] }
  0x31   :  { %v335_v44 = vmax.f32 %v312_v30, %v313_v34  ;;  %v273_v45 = vmax.f32 %v209_v35, 0.0  ;;  %v210_v46 = vadd.f32 %v407_v13, %v134_v33  ;;  %v211_v47 = vadd.f32 %v409_v14, %v135_v37  ;;  %v74_v34 = vld [vmem:[%s766_s0 + $0x1e0] sm:$0xff] }
  0x32   :  { %v314_v50 = vmax.f32 %v270_v36, %v272_v40  ;;  %v212_v51 = vadd.f32 %v407_v13, %v136_v41  ;;  %v213_v52 = vadd.f32 %v409_v14, %v137_v42  ;;  %v138_v53 = vmul.f32 %v403_v11, %v62_v38 }
  0x33   :  { %351 = vst [vmem:[%s767_s3 + $0x48] sm:$0xff] %v335_v44  ;;  %v315_v55 = vmax.f32 %v271_v39, %v273_v45  ;;  %v274_v56 = vmax.f32 %v210_v46, 0.0  ;;  %v275_v57 = vmax.f32 %v211_v47, 0.0  ;;  %v139_v58 = vmul.f32 %v405_v12, %v63_v43  ;;  %v75_v39 = vld [vmem:[%s766_s0 + $0x1e8] sm:$0xff]  ;;  %v76_v44 = vld [vmem:[%s766_s0 + $0x1f0] sm:$0xff]  ;;  %v77_v45 = vld [vmem:[%s766_s0 + $0x1f8] sm:$0xff] }
  0x34   :  { %v276_v59 = vmax.f32 %v212_v51, 0.0  ;;  %v277_v60 = vmax.f32 %v213_v52, 0.0  ;;  %v140_v61 = vmul.f32 %v403_v11, %v64_v48  ;;  %v141_v62 = vmul.f32 %v405_v12, %v65_v49 }
  0x35   :  { %v336_v1 = vmax.f32 %v314_v50, %v315_v55  ;;  %v214_v2 = vadd.f32 %v407_v13, %v138_v53  ;;  %v215_v3 = vadd.f32 %v409_v14, %v139_v58  ;;  %v142_v5 = vmul.f32 %v403_v11, %v66_v54 }
  0x36   :  { %v316_v6 = vmax.f32 %v274_v56, %v276_v59  ;;  %v317_v7 = vmax.f32 %v275_v57, %v277_v60  ;;  %v216_v8 = vadd.f32 %v407_v13, %v140_v61  ;;  %v217_v9 = vadd.f32 %v409_v14, %v141_v62 }
  0x37   :  { %352 = vst [vmem:[%s767_s3 + $0x50] sm:$0xff] %v336_v1  ;;  %v278_v15 = vmax.f32 %v214_v2, 0.0  ;;  %v279_v16 = vmax.f32 %v215_v3, 0.0  ;;  %v143_v17 = vmul.f32 %v405_v12, %v67_v63  ;;  %v144_v18 = vmul.f32 %v403_v11, %v68_v0 }
  0x38   :  { %v337_v20 = vmax.f32 %v316_v6, %v317_v7  ;;  %v280_v21 = vmax.f32 %v216_v8, 0.0  ;;  %v281_v22 = vmax.f32 %v217_v9, 0.0  ;;  %v145_v23 = vmul.f32 %v405_v12, %v69_v4 }
  0x39   :  { %v218_v25 = vadd.f32 %v407_v13, %v142_v5  ;;  %v219_v26 = vadd.f32 %v409_v14, %v143_v17  ;;  %v220_v27 = vadd.f32 %v407_v13, %v144_v18  ;;  %v146_v29 = vmul.f32 %v403_v11, %v70_v10 }
  0x3a   :  { %353 = vst [vmem:[%s767_s3 + $0x58] sm:$0xff] %v337_v20  ;;  %v318_v30 = vmax.f32 %v278_v15, %v280_v21  ;;  %v319_v31 = vmax.f32 %v279_v16, %v281_v22  ;;  %v221_v32 = vadd.f32 %v409_v14, %v145_v23  ;;  %v147_v33 = vmul.f32 %v405_v12, %v71_v19 }
  0x3b   :  { %v282_v35 = vmax.f32 %v218_v25, 0.0  ;;  %v283_v36 = vmax.f32 %v219_v26, 0.0  ;;  %v284_v37 = vmax.f32 %v220_v27, 0.0  ;;  %v148_v38 = vmul.f32 %v403_v11, %v72_v24 }
  0x3c   :  { %v338_v40 = vmax.f32 %v318_v30, %v319_v31  ;;  %v285_v41 = vmax.f32 %v221_v32, 0.0  ;;  %v149_v42 = vmul.f32 %v405_v12, %v73_v28  ;;  %v222_v43 = vadd.f32 %v407_v13, %v146_v29 }
  0x3d   :  { %v320_v46 = vmax.f32 %v282_v35, %v284_v37  ;;  %v223_v47 = vadd.f32 %v409_v14, %v147_v33  ;;  %v224_v48 = vadd.f32 %v407_v13, %v148_v38  ;;  %v150_v49 = vmul.f32 %v403_v11, %v74_v34 }
  0x3e   :  { %354 = vst [vmem:[%s767_s3 + $0x60] sm:$0xff] %v338_v40  ;;  %v321_v50 = vmax.f32 %v283_v36, %v285_v41  ;;  %v225_v51 = vadd.f32 %v409_v14, %v149_v42  ;;  %v286_v52 = vmax.f32 %v222_v43, 0.0  ;;  %v151_v53 = vmul.f32 %v405_v12, %v75_v39 }
  0x3f   :  { %v287_v54 = vmax.f32 %v223_v47, 0.0  ;;  %v288_v55 = vmax.f32 %v224_v48, 0.0  ;;  %v152_v56 = vmul.f32 %v403_v11, %v76_v44  ;;  %v153_v57 = vmul.f32 %v405_v12, %v77_v45 }
  0x40   :  { %v339_v58 = vmax.f32 %v320_v46, %v321_v50  ;;  %v289_v59 = vmax.f32 %v225_v51, 0.0  ;;  %v226_v60 = vadd.f32 %v407_v13, %v150_v49  ;;  %v227_v61 = vadd.f32 %v409_v14, %v151_v53 }
  0x41   :  { %v322_v62 = vmax.f32 %v286_v52, %v288_v55  ;;  %v228_v63 = vadd.f32 %v407_v13, %v152_v56  ;;  %v229_v0 = vadd.f32 %v409_v14, %v153_v57 }
  0x42   :  { %355 = vst [vmem:[%s767_s3 + $0x68] sm:$0xff] %v339_v58  ;;  %v323_v1 = vmax.f32 %v287_v54, %v289_v59  ;;  %v290_v2 = vmax.f32 %v226_v60, 0.0  ;;  %v291_v11 = vmax.f32 %v227_v61, 0.0 }
  0x43   :  { %v292_v3 = vmax.f32 %v228_v63, 0.0  ;;  %v293_v12 = vmax.f32 %v229_v0, 0.0 }
  0x44   :  { %v340_v4 = vmax.f32 %v322_v62, %v323_v1 }
  0x45   :  { %v324_v5 = vmax.f32 %v290_v2, %v292_v3  ;;  %v325_v6 = vmax.f32 %v291_v11, %v293_v12 }
  0x46   :  { %356 = vst [vmem:[%s767_s3 + $0x70] sm:$0xff] %v340_v4 }
  0x47   :  { %v341_v7 = vmax.f32 %v324_v5, %v325_v6 }
  0x49   :  { %357 = vst [vmem:[%s767_s3 + $0x78] sm:$0xff] %v341_v7 }

// kernel: downlayer_forward.6
= control target key start
LH: loop header
LB: loop body
LE: loop exit
PB: predicated region body
PF: predicated region fallthrough
CT: control target
= control target key end

     0   :  { %s931_s12 = smov 0   ;;  %s1097_s0 = inlined_call_operand.vmem [shape: bf16[512,40], index: 0, kind: input, shape index: {}]   ;;  %s1098_s1 = inlined_call_operand.vmem [shape: bf16[40,128], index: 1, kind: input, shape index: {}]   ;;  %s1099_s2 = inlined_call_operand.vmem [shape: f32[512,128], index: 2, kind: output, shape index: {0}]   ;;  %s1100_s3 = inlined_call_operand.vmem [shape: f32[16,128], index: 3, kind: output, shape index: {1}]  }
   0x1 LB: > { %s937_s13 = sadd.s32 4294967295, %s909_s12   ;;  %p768_p0 = scmp.ge.s32.totalorder %s909_s12, 1  ;;  %s909_s12 = sphi %s931_s12, %s14_s12  }
   0x2   : > { %p141_p1 = scmp.lt.s32.totalorder %s909_s12, 3 }
   0x4   : > { %p142_p2 = pnand %p768_p0, %p141_p1 }
   0x5   : > { %v884_v0 = vld [vmem:[%s1098_s1] sm:$0xff] (!%p142_p2)   ;;  %v885_v1 = vld [vmem:[%s1098_s1 + $0x8] sm:$0xff] (!%p142_p2)   ;;  %s769_s18 = sshll.u32 (!%p142_p2), %s937_s13, 5  ;;  %v886_v2 = vld [vmem:[%s1098_s1 + $0x10] ss:$0 sps:$4 sm:$0xff] (!%p142_p2)   ;;  %vm367_vm0 = vcmask (!%p142_p2), 1043456  }
   0x6   : > { %145 = sbr.rel (%p142_p2) target bundleno = 312 (0x138), region = 28  ;;  %830 = vmatprep.subr.bf16.mxu0 (!%p142_p2), %v884_v0  ;;  %p170_p3 = scmp.lt.s32.totalorder (!%p142_p2), %s769_s18, 63  ;;  %868 = vmatprep.subr.bf16.mxu1 (!%p142_p2), %v884_v0  ;;  %vm318_vm1 = vcmask (!%p142_p2), 326656   ;;  %v369_v3 = vsel (!%p142_p2), %vm367_vm0, %v886_v2, 0 }
   0x7   : > { %831 = vmatpush3.bf16.msra.mxu0 (!%p142_p2), %v884_v0  ;;  %871 = vmatpush3.bf16.msra.mxu1 (!%p142_p2), %v884_v0  ;;  %p181_p4 = scmp.lt.s32.totalorder (!%p142_p2), %s937_s13, 1 }
   0x8   : > { %832 = vmatprep.subr.bf16.mxu0 (!%p142_p2), %v885_v1  ;;  %869 = vmatprep.subr.bf16.mxu1 (!%p142_p2), %v885_v1 }
   0xb   : > { %833 = vmatpush3.bf16.msra.mxu0 (!%p142_p2), %v885_v1  ;;  %872 = vmatpush3.bf16.msra.mxu1 (!%p142_p2), %v885_v1 }
   0xc   : > { %874 = vmatprep.subr.msk.bf16.mxu0 (!%p142_p2), %vm367_vm0, %v886_v2  ;;  %875 = vmatprep.subr.msk.bf16.mxu1 (!%p142_p2), %vm367_vm0, %v886_v2 }
   0xd   : > { %s1102_s18 = smov (!%p170_p3, %s769_s18), 63  ;;  %s1104_s13 = smov (!%p181_p4, %s937_s13), 1 }
   0xe   : > { %s770_s21 = sshll.u32 %s1102_s18, 2  ;;  %s772_s25 = sshll.u32 %s1102_s18, 3 }
   0xf   : > { %s957_s24 = scalar_lea.vmem %s1097_s0, %s770_s21  ;;  %835 = vmatpush3.bf16.msra.mxu0 %v369_v3  ;;  %873 = vmatpush3.bf16.msra.mxu1 %v369_v3  ;;  %s995_s28 = scalar_lea.vmem %s1099_s2, %s772_s25 }
  0x10   : > { %v887_v4 = vld [vmem:[%s957_s24] sm:$0xff]   ;;  %v888_v5 = vld [vmem:[%s957_s24 + $0x8] sm:$0xff]   ;;  %v889_v6 = vld [vmem:[%s957_s24 + $0x10] sm:$0xff]   ;;  %s773_s29 = sshll.u32 %s1104_s13, 3 }
  0x11   : > { %836 = vmatprep.mubr.msk.bf16.mxu0 %vm318_vm1, %v887_v4  ;;  %v890_v7 = vld [vmem:[%s957_s24 + $0x18] sm:$0xff]   ;;  %v895_v8 = vld [vmem:[%s957_s24 + $0x40] sm:$0xff]   ;;  %v896_v9 = vld [vmem:[%s957_s24 + $0x48] sm:$0xff]   ;;  %s184_s5 = scalar_lea.vmem %s1100_s3, %s773_s29 }
  0x12   : > { %837 = vmatmul.mubr.msk.bf16.vlgmr.msra.gmra.mrb[0].mxu0 %vm318_vm1, %v888_v5  ;;  %852 = vmatprep.mubr.msk.bf16.mxu1 %vm318_vm1, %v895_v8  ;;  %v897_v10 = vld [vmem:[%s957_s24 + $0x50] sm:$0xff]   ;;  %v891_v11 = vld [vmem:[%s957_s24 + $0x20] sm:$0xff]   ;;  %v898_v12 = vld [vmem:[%s957_s24 + $0x58] sm:$0xff]  }
  0x13   : > { %840 = vmatprep.mubr.msk.bf16.mxu0 %vm318_vm1, %v889_v6  ;;  %853 = vmatmul.mubr.msk.bf16.vlgmr.msra.gmra.mrb[0].mxu1 %vm318_vm1, %v896_v9  ;;  %v899_v13 = vld [vmem:[%s957_s24 + $0x60] sm:$0xff]   ;;  %v892_v14 = vld [vmem:[%s957_s24 + $0x28] sm:$0xff]   ;;  %v893_v15 = vld [vmem:[%s957_s24 + $0x30] sm:$0xff]  }
  0x14   : > { %856 = vmatprep.mubr.msk.bf16.mxu1 %vm318_vm1, %v897_v10  ;;  %v900_v16 = vld [vmem:[%s957_s24 + $0x68] sm:$0xff]   ;;  %v901_v17 = vld [vmem:[%s957_s24 + $0x70] sm:$0xff]   ;;  %v894_v18 = vld [vmem:[%s957_s24 + $0x38] sm:$0xff]  }
  0x15   : > { %v902_v19 = vld [vmem:[%s957_s24 + $0x78] sm:$0xff]  }
  0x1a   : > { %841 = vmatmul.mubr.msk.bf16.gmra.mrb[4].mxu0 %vm318_vm1, %v890_v7 }
  0x1b   : > { %844 = vmatprep.mubr.msk.bf16.mxu0 %vm318_vm1, %v891_v11  ;;  %857 = vmatmul.mubr.msk.bf16.gmra.mrb[4].mxu1 %vm318_vm1, %v898_v12 }
  0x1c   : > { %860 = vmatprep.mubr.msk.bf16.mxu1 %vm318_vm1, %v899_v13 }
  0x22   : > { %845 = vmatmul.mubr.msk.bf16.gmra.mrb[8].mxu0 %vm318_vm1, %v892_v14 }
  0x23   : > { %848 = vmatprep.mubr.msk.bf16.mxu0 %vm318_vm1, %v893_v15  ;;  %861 = vmatmul.mubr.msk.bf16.gmra.mrb[8].mxu1 %vm318_vm1, %v900_v16 }
  0x24   : > { %864 = vmatprep.mubr.msk.bf16.mxu1 %vm318_vm1, %v901_v17 }
  0x2a   : > { %849 = vmatmul.mubr.msk.bf16.gmra.mrb[12].mxu0 %vm318_vm1, %v894_v18 }
  0x2b   : > { %865 = vmatmul.mubr.msk.bf16.gmra.mrb[12].mxu1 %vm318_vm1, %v902_v19 }
  0xe5   : > { %v838_v20 = vpop.f32.mrb[0].mxu0 }
  0xe6   : > { %534 = vst [vmem:[%s995_s28 + $0x10] sm:$0xff] %v838_v20  ;;  %v405_v21 = vpop.f32.mrb[1].mxu0  ;;  %v1001_v27 = vpop.f32.mrb[0].mxu1  ;;  %v603_v28 = vmul.f32 %v838_v20, %v838_v20 }
  0xe7   : > { %532 = vst [vmem:[%s995_s28] sm:$0xff] %v405_v21  ;;  %v839_v22 = vpop.f32.mrb[2].mxu0  ;;  %v601_v24 = vmul.f32 %v405_v21, %v405_v21  ;;  %550 = vst [vmem:[%s995_s28 + $0x90] sm:$0xff] %v1001_v27  ;;  %v1005_v31 = vpop.f32.mrb[1].mxu1 }
  0xe8   : > { %535 = vst [vmem:[%s995_s28 + $0x18] sm:$0xff] %v839_v22  ;;  %v408_v23 = vpop.f32.mrb[3].mxu0  ;;  %548 = vst [vmem:[%s995_s28 + $0x80] sm:$0xff] %v1005_v31  ;;  %v1009_v32 = vpop.f32.mrb[2].mxu1  ;;  %v604_v33 = vmul.f32 %v839_v22, %v839_v22 }
  0xe9   : > { %533 = vst [vmem:[%s995_s28 + $0x8] sm:$0xff] %v408_v23  ;;  %v564_v25 = vadd.f32 %v408_v23, %v405_v21  ;;  %v602_v26 = vmul.f32 %v408_v23, %v408_v23  ;;  %551 = vst [vmem:[%s995_s28 + $0x98] sm:$0xff] %v1009_v32  ;;  %v1013_v37 = vpop.f32.mrb[3].mxu1 }
  0xea   : > { %549 = vst [vmem:[%s995_s28 + $0x88] sm:$0xff] %v1013_v37 }
  0xeb   : > { %v565_v29 = vadd.f32 %v838_v20, %v564_v25  ;;  %v633_v30 = vadd.f32 %v602_v26, %v601_v24 }
  0xed   : > { %v634_v34 = vadd.f32 %v633_v30, %v603_v28  ;;  %v842_v35 = vpop.f32.mrb[4].mxu0  ;;  %v566_v36 = vadd.f32 %v839_v22, %v565_v29 }
  0xee   : > { %538 = vst [vmem:[%s995_s28 + $0x30] sm:$0xff] %v842_v35  ;;  %v421_v38 = vpop.f32.mrb[5].mxu0  ;;  %v1021_v47 = vpop.f32.mrb[4].mxu1  ;;  %v607_v48 = vmul.f32 %v842_v35, %v842_v35 }
  0xef   : > { %536 = vst [vmem:[%s995_s28 + $0x20] sm:$0xff] %v421_v38  ;;  %v567_v39 = vadd.f32 %v566_v36, %v421_v38  ;;  %v605_v40 = vmul.f32 %v421_v38, %v421_v38  ;;  %v635_v41 = vadd.f32 %v634_v34, %v604_v33  ;;  %v843_v42 = vpop.f32.mrb[6].mxu0  ;;  %554 = vst [vmem:[%s995_s28 + $0xb0] sm:$0xff] %v1021_v47  ;;  %v1025_v51 = vpop.f32.mrb[5].mxu1 }
  0xf0   : > { %539 = vst [vmem:[%s995_s28 + $0x38] sm:$0xff] %v843_v42  ;;  %v424_v43 = vpop.f32.mrb[7].mxu0  ;;  %552 = vst [vmem:[%s995_s28 + $0xa0] sm:$0xff] %v1025_v51  ;;  %v1029_v52 = vpop.f32.mrb[6].mxu1  ;;  %v608_v53 = vmul.f32 %v843_v42, %v843_v42 }
  0xf1   : > { %v636_v44 = vadd.f32 %v635_v41, %v605_v40  ;;  %537 = vst [vmem:[%s995_s28 + $0x28] sm:$0xff] %v424_v43  ;;  %v568_v45 = vadd.f32 %v567_v39, %v424_v43  ;;  %v606_v46 = vmul.f32 %v424_v43, %v424_v43  ;;  %555 = vst [vmem:[%s995_s28 + $0xb8] sm:$0xff] %v1029_v52  ;;  %v1033_v57 = vpop.f32.mrb[7].mxu1 }
  0xf2   : > { %553 = vst [vmem:[%s995_s28 + $0xa8] sm:$0xff] %v1033_v57  ;;  %v619_v43 = vmul.f32 %v1001_v27, %v1001_v27 }
  0xf3   : > { %v569_v49 = vadd.f32 %v842_v35, %v568_v45  ;;  %v637_v50 = vadd.f32 %v636_v44, %v606_v46  ;;  %v617_v35 = vmul.f32 %v1005_v31, %v1005_v31  ;;  %v620_v46 = vmul.f32 %v1009_v32, %v1009_v32 }
  0xf5   : > { %v638_v54 = vadd.f32 %v637_v50, %v607_v48  ;;  %v846_v55 = vpop.f32.mrb[8].mxu0  ;;  %v570_v56 = vadd.f32 %v843_v42, %v569_v49  ;;  %v618_v42 = vmul.f32 %v1013_v37, %v1013_v37 }
  0xf6   : > { %542 = vst [vmem:[%s995_s28 + $0x50] sm:$0xff] %v846_v55  ;;  %v437_v58 = vpop.f32.mrb[9].mxu0  ;;  %v1041_v3 = vpop.f32.mrb[8].mxu1  ;;  %v611_v4 = vmul.f32 %v846_v55, %v846_v55 }
  0xf7   : > { %540 = vst [vmem:[%s995_s28 + $0x40] sm:$0xff] %v437_v58  ;;  %v571_v59 = vadd.f32 %v570_v56, %v437_v58  ;;  %v609_v60 = vmul.f32 %v437_v58, %v437_v58  ;;  %v639_v61 = vadd.f32 %v638_v54, %v608_v53  ;;  %v847_v62 = vpop.f32.mrb[10].mxu0  ;;  %558 = vst [vmem:[%s995_s28 + $0xd0] sm:$0xff] %v1041_v3  ;;  %v501_v7 = vpop.f32.mrb[9].mxu1 }
  0xf8   : > { %543 = vst [vmem:[%s995_s28 + $0x58] sm:$0xff] %v847_v62  ;;  %v440_v63 = vpop.f32.mrb[11].mxu0  ;;  %556 = vst [vmem:[%s995_s28 + $0xc0] sm:$0xff] %v501_v7  ;;  %v1046_v8 = vpop.f32.mrb[10].mxu1  ;;  %v612_v9 = vmul.f32 %v847_v62, %v847_v62 }
  0xf9   : > { %v640_v0 = vadd.f32 %v639_v61, %v609_v60  ;;  %541 = vst [vmem:[%s995_s28 + $0x48] sm:$0xff] %v440_v63  ;;  %v572_v1 = vadd.f32 %v571_v59, %v440_v63  ;;  %v610_v2 = vmul.f32 %v440_v63, %v440_v63  ;;  %559 = vst [vmem:[%s995_s28 + $0xd8] sm:$0xff] %v1046_v8  ;;  %v504_v13 = vpop.f32.mrb[11].mxu1 }
  0xfa   : > { %557 = vst [vmem:[%s995_s28 + $0xc8] sm:$0xff] %v504_v13 }
  0xfb   : > { %v573_v5 = vadd.f32 %v846_v55, %v572_v1  ;;  %v641_v6 = vadd.f32 %v640_v0, %v610_v2  ;;  %v622_v55 = vmul.f32 %v1033_v57, %v1033_v57  ;;  %v626_v1 = vmul.f32 %v504_v13, %v504_v13 }
  0xfd   : > { %v642_v10 = vadd.f32 %v641_v6, %v611_v4  ;;  %v850_v11 = vpop.f32.mrb[12].mxu0  ;;  %v574_v12 = vadd.f32 %v847_v62, %v573_v5 }
  0xfe   : > { %546 = vst [vmem:[%s995_s28 + $0x70] sm:$0xff] %v850_v11  ;;  %v453_v14 = vpop.f32.mrb[13].mxu0  ;;  %v866_v23 = vpop.f32.mrb[12].mxu1  ;;  %v615_v24 = vmul.f32 %v850_v11, %v850_v11 }
  0xff   : > { %544 = vst [vmem:[%s995_s28 + $0x60] sm:$0xff] %v453_v14  ;;  %v575_v15 = vadd.f32 %v574_v12, %v453_v14  ;;  %v613_v16 = vmul.f32 %v453_v14, %v453_v14  ;;  %v643_v17 = vadd.f32 %v642_v10, %v612_v9  ;;  %v851_v18 = vpop.f32.mrb[14].mxu0  ;;  %562 = vst [vmem:[%s995_s28 + $0xf0] sm:$0xff] %v866_v23  ;;  %v517_v28 = vpop.f32.mrb[13].mxu1 }
 0x100   : > { %547 = vst [vmem:[%s995_s28 + $0x78] sm:$0xff] %v851_v18  ;;  %v456_v19 = vpop.f32.mrb[15].mxu0  ;;  %560 = vst [vmem:[%s995_s28 + $0xe0] sm:$0xff] %v517_v28  ;;  %v867_v29 = vpop.f32.mrb[14].mxu1  ;;  %v616_v30 = vmul.f32 %v851_v18, %v851_v18 }
 0x101   : > { %v644_v20 = vadd.f32 %v643_v17, %v613_v16  ;;  %545 = vst [vmem:[%s995_s28 + $0x68] sm:$0xff] %v456_v19  ;;  %v576_v21 = vadd.f32 %v575_v15, %v456_v19  ;;  %v614_v22 = vmul.f32 %v456_v19, %v456_v19  ;;  %563 = vst [vmem:[%s995_s28 + $0xf8] sm:$0xff] %v867_v29  ;;  %v520_v36 = vpop.f32.mrb[15].mxu1 }
 0x102   : > { %561 = vst [vmem:[%s995_s28 + $0xe8] sm:$0xff] %v520_v36  ;;  %v630_v12 = vmul.f32 %v520_v36, %v520_v36  ;;  %v632_v16 = vmul.f32 %v867_v29, %v867_v29 }
 0x103   : > { %v577_v25 = vadd.f32 %v850_v11, %v576_v21  ;;  %v645_v26 = vadd.f32 %v644_v20, %v614_v22  ;;  %v670_v22 = vlaneseq }
 0x105   : > { %v646_v33 = vadd.f32 %v645_v26, %v615_v24  ;;  %v578_v34 = vadd.f32 %v851_v18, %v577_v25 }
 0x107   : > { %v579_v38 = vadd.f32 %v578_v34, %v1005_v31  ;;  %v647_v39 = vadd.f32 %v646_v33, %v616_v30  ;;  %v621_v31 = vmul.f32 %v1025_v51, %v1025_v51 }
 0x109   : > { %v648_v40 = vadd.f32 %v647_v39, %v617_v35  ;;  %v580_v41 = vadd.f32 %v579_v38, %v1013_v37 }
 0x10b   : > { %v581_v44 = vadd.f32 %v1001_v27, %v580_v41  ;;  %v649_v45 = vadd.f32 %v648_v40, %v618_v42  ;;  %v623_v27 = vmul.f32 %v1021_v47, %v1021_v47 }
 0x10d   : > { %v650_v48 = vadd.f32 %v649_v45, %v619_v43  ;;  %v582_v49 = vadd.f32 %v1009_v32, %v581_v44  ;;  %v624_v32 = vmul.f32 %v1029_v52, %v1029_v52 }
 0x10f   : > { %v583_v50 = vadd.f32 %v582_v49, %v1025_v51  ;;  %v651_v53 = vadd.f32 %v650_v48, %v620_v46  ;;  %v625_v51 = vmul.f32 %v501_v7, %v501_v7 }
 0x111   : > { %v652_v54 = vadd.f32 %v651_v53, %v621_v31  ;;  %v584_v37 = vadd.f32 %v583_v50, %v1033_v57  ;;  %v627_v57 = vmul.f32 %v1041_v3, %v1041_v3 }
 0x113   : > { %v585_v56 = vadd.f32 %v1021_v47, %v584_v37  ;;  %v653_v58 = vadd.f32 %v652_v54, %v622_v55  ;;  %v628_v47 = vmul.f32 %v1046_v8, %v1046_v8 }
 0x115   : > { %v654_v59 = vadd.f32 %v653_v58, %v623_v27  ;;  %v586_v60 = vadd.f32 %v1029_v52, %v585_v56  ;;  %v629_v52 = vmul.f32 %v517_v28, %v517_v28 }
 0x117   : > { %v587_v61 = vadd.f32 %v586_v60, %v501_v7  ;;  %v655_v62 = vadd.f32 %v654_v59, %v624_v32 }
 0x119   : > { %v656_v63 = vadd.f32 %v655_v62, %v625_v51  ;;  %v588_v0 = vadd.f32 %v587_v61, %v504_v13  ;;  %v631_v13 = vmul.f32 %v866_v23, %v866_v23 }
 0x11b   : > { %v589_v2 = vadd.f32 %v1041_v3, %v588_v0  ;;  %v657_v4 = vadd.f32 %v656_v63, %v626_v1 }
 0x11d   : > { %v658_v5 = vadd.f32 %v657_v4, %v627_v57  ;;  %v590_v6 = vadd.f32 %v1046_v8, %v589_v2 }
 0x11f   : > { %v591_v9 = vadd.f32 %v590_v6, %v517_v28  ;;  %v659_v7 = vadd.f32 %v658_v5, %v628_v47  ;;  %v671_v28 = vshrl.u32 %v670_v22, 7 }
 0x121   : > { %v660_v10 = vadd.f32 %v659_v7, %v629_v52  ;;  %v592_v11 = vadd.f32 %v591_v9, %v520_v36  ;;  %vm673_vm2 = vcmp.eq.s32.totalorder %v671_v28, 1  ;;  %vm672_vm3 = vcmp.eq.s32.totalorder %v671_v28, 0 }
 0x123   : > { %v593_v14 = vadd.f32 %v866_v23, %v592_v11  ;;  %v661_v15 = vadd.f32 %v660_v10, %v630_v12 }
 0x125   : > { %v594_v3 = vadd.f32 %v867_v29, %v593_v14  ;;  %v662_v17 = vadd.f32 %v661_v15, %v631_v13 }
 0x127   : > { %v595_v18 = vrot.slane %v594_v3, 4  ;;  %v663_v19 = vadd.f32 %v662_v17, %v632_v16 }
 0x129   : > { %v596_v20 = vadd.f32 %v595_v18, %v594_v3  ;;  %v664_v21 = vrot.slane %v663_v19, 4 }
 0x12b   : > { %v597_v8 = vrot.slane %v596_v20, 2  ;;  %v665_v24 = vadd.f32 %v664_v21, %v663_v19 }
 0x12d   : > { %v598_v25 = vadd.f32 %v597_v8, %v596_v20  ;;  %v666_v26 = vrot.slane %v665_v24, 2 }
 0x12f   : > { %v667_v30 = vadd.f32 %v666_v26, %v665_v24  ;;  %v599_v33 = vrot.slane %v598_v25, 1 }
 0x131   : > { %v668_v23 = vrot.slane %v667_v30, 1  ;;  %v600_v29 = vadd.f32 %v599_v33, %v598_v25 }
 0x133   : > { %v669_v34 = vadd.f32 %v668_v23, %v667_v30 }
 0x135   : > { %v674_v35 = vsel %vm673_vm2, %v669_v34, 0.0 }
 0x136   : > { %v675_v36 = vsel %vm672_vm3, %v600_v29, %v674_v35 }
 0x137   : > { %676 = vst [vmem:[%s184_s5] sm:$0xff] %v675_v36 }
 0x138 PF: > { %s14_s12 = sadd.s32 1, %s909_s12  }
 0x139   : > { %p11_p5 = scmp.ge.s32.totalorder %s14_s12, 4  }
 0x13b   :  { %13 = sbr.rel (!%p11_p5) target bundleno = 1 (0x1), region = 70 }

// kernel: downlayer_forward.8
= control target key start
LH: loop header
LB: loop body
LE: loop exit
PB: predicated region body
PF: predicated region fallthrough
CT: control target
= control target key end

     0   :  { %vm106_vm0 = vcmask 588800   ;;  %vm131_vm1 = vcmask 1043456   ;;  %s524_s1 = inlined_call_operand.vmem [shape: bf16[72,128], index: 1, kind: input, shape index: {}]   ;;  %s525_s0 = inlined_call_operand.vmem [shape: bf16[128,72], index: 0, kind: input, shape index: {}]   ;;  %s526_s2 = inlined_call_operand.vmem [shape: f32[128,128], index: 2, kind: output, shape index: {0}]   ;;  %s527_s3 = inlined_call_operand.vmem [shape: f32[8,128], index: 3, kind: output, shape index: {1}]  }
   0x1   :  { %v393_v0 = vld [vmem:[%s524_s1] sm:$0xff]   ;;  %v394_v1 = vld [vmem:[%s524_s1 + $0x8] sm:$0xff]   ;;  %v395_v2 = vld [vmem:[%s524_s1 + $0x10] sm:$0xff]  }
   0x2   :  { %355 = vmatprep.subr.bf16.mxu0 %v393_v0  ;;  %381 = vmatprep.subr.bf16.mxu1 %v393_v0  ;;  %v398_v3 = vld [vmem:[%s525_s0] sm:$0xff]   ;;  %v396_v4 = vld [vmem:[%s524_s1 + $0x18] sm:$0xff]   ;;  %v399_v8 = vld [vmem:[%s525_s0 + $0x8] sm:$0xff]  }
   0x3   :  { %356 = vmatpush3.bf16.msra.mxu0 %v393_v0  ;;  %386 = vmatpush3.bf16.msra.mxu1 %v393_v0  ;;  %v402_v5 = vld [vmem:[%s525_s0 + $0x20] sm:$0xff]   ;;  %v403_v9 = vld [vmem:[%s525_s0 + $0x28] sm:$0xff]   ;;  %v400_v10 = vld [vmem:[%s525_s0 + $0x10] sm:$0xff]  }
   0x4   :  { %357 = vmatprep.subr.bf16.mxu0 %v394_v1  ;;  %382 = vmatprep.subr.bf16.mxu1 %v394_v1  ;;  %v397_v6 = vld [vmem:[%s524_s1 + $0x20] ss:$0 sps:$4 sm:$0xff]   ;;  %v404_v11 = vld [vmem:[%s525_s0 + $0x30] sm:$0xff]   ;;  %v401_v12 = vld [vmem:[%s525_s0 + $0x18] sm:$0xff]  }
   0x5   :  { %365 = vmatprep.mubr.msk.bf16.mxu0 %vm106_vm0, %v398_v3  ;;  %373 = vmatprep.mubr.msk.bf16.mxu1 %vm106_vm0, %v402_v5  ;;  %v133_v7 = vsel %vm131_vm1, %v397_v6, 0  ;;  %v405_v13 = vld [vmem:[%s525_s0 + $0x38] sm:$0xff]  }
   0x7   :  { %358 = vmatpush3.bf16.msra.mxu0 %v394_v1  ;;  %387 = vmatpush3.bf16.msra.mxu1 %v394_v1 }
   0x8   :  { %359 = vmatprep.subr.bf16.mxu0 %v395_v2  ;;  %383 = vmatprep.subr.bf16.mxu1 %v395_v2 }
   0xb   :  { %360 = vmatpush3.bf16.msra.mxu0 %v395_v2  ;;  %388 = vmatpush3.bf16.msra.mxu1 %v395_v2 }
   0xc   :  { %361 = vmatprep.subr.bf16.mxu0 %v396_v4  ;;  %384 = vmatprep.subr.bf16.mxu1 %v396_v4 }
   0xf   :  { %362 = vmatpush3.bf16.msra.mxu0 %v396_v4  ;;  %389 = vmatpush3.bf16.msra.mxu1 %v396_v4 }
  0x10   :  { %391 = vmatprep.subr.msk.bf16.mxu0 %vm131_vm1, %v397_v6  ;;  %392 = vmatprep.subr.msk.bf16.mxu1 %vm131_vm1, %v397_v6 }
  0x13   :  { %364 = vmatpush3.bf16.msra.mxu0 %v133_v7  ;;  %390 = vmatpush3.bf16.msra.mxu1 %v133_v7 }
  0x16   :  { %366 = vmatmul.mubr.msk.bf16.vlgmr.msra.gmra.mrb[0].mxu0 %vm106_vm0, %v399_v8  ;;  %374 = vmatmul.mubr.msk.bf16.vlgmr.msra.gmra.mrb[0].mxu1 %vm106_vm0, %v403_v9 }
  0x17   :  { %369 = vmatprep.mubr.msk.bf16.mxu0 %vm106_vm0, %v400_v10  ;;  %377 = vmatprep.mubr.msk.bf16.mxu1 %vm106_vm0, %v404_v11 }
  0x1e   :  { %370 = vmatmul.mubr.msk.bf16.gmra.mrb[4].mxu0 %vm106_vm0, %v401_v12  ;;  %378 = vmatmul.mubr.msk.bf16.gmra.mrb[4].mxu1 %vm106_vm0, %v405_v13 }
  0xe9   :  { %v367_v14 = vpop.f32.mrb[0].mxu0  ;;  %v375_v15 = vpop.f32.mrb[0].mxu1 }
  0xea   :  { %234 = vst [vmem:[%s526_s2 + $0x10] sm:$0xff] %v367_v14  ;;  %v169_v16 = vpop.f32.mrb[1].mxu0  ;;  %242 = vst [vmem:[%s526_s2 + $0x50] sm:$0xff] %v375_v15  ;;  %v201_v17 = vpop.f32.mrb[1].mxu1  ;;  %v271_v25 = vmul.f32 %v367_v14, %v367_v14  ;;  %v279_v57 = vmul.f32 %v375_v15, %v375_v15 }
  0xeb   :  { %232 = vst [vmem:[%s526_s2] sm:$0xff] %v169_v16  ;;  %v368_v18 = vpop.f32.mrb[2].mxu0  ;;  %240 = vst [vmem:[%s526_s2 + $0x40] sm:$0xff] %v201_v17  ;;  %v376_v19 = vpop.f32.mrb[2].mxu1  ;;  %v269_v22 = vmul.f32 %v169_v16, %v169_v16  ;;  %v277_v51 = vmul.f32 %v201_v17, %v201_v17 }
  0xec   :  { %235 = vst [vmem:[%s526_s2 + $0x18] sm:$0xff] %v368_v18  ;;  %v172_v20 = vpop.f32.mrb[3].mxu0  ;;  %243 = vst [vmem:[%s526_s2 + $0x58] sm:$0xff] %v376_v19  ;;  %v204_v21 = vpop.f32.mrb[3].mxu1  ;;  %v272_v28 = vmul.f32 %v368_v18, %v368_v18  ;;  %v280_v60 = vmul.f32 %v376_v19, %v376_v19 }
  0xed   :  { %233 = vst [vmem:[%s526_s2 + $0x8] sm:$0xff] %v172_v20  ;;  %v248_v23 = vadd.f32 %v172_v20, %v169_v16  ;;  %v270_v24 = vmul.f32 %v172_v20, %v172_v20  ;;  %241 = vst [vmem:[%s526_s2 + $0x48] sm:$0xff] %v204_v21  ;;  %v278_v56 = vmul.f32 %v204_v21, %v204_v21 }
  0xef   :  { %v249_v26 = vadd.f32 %v367_v14, %v248_v23  ;;  %v285_v27 = vadd.f32 %v270_v24, %v269_v22 }
  0xf1   :  { %v286_v29 = vadd.f32 %v285_v27, %v271_v25  ;;  %v371_v30 = vpop.f32.mrb[4].mxu0  ;;  %v250_v31 = vadd.f32 %v368_v18, %v249_v26  ;;  %v379_v32 = vpop.f32.mrb[4].mxu1 }
  0xf2   :  { %238 = vst [vmem:[%s526_s2 + $0x30] sm:$0xff] %v371_v30  ;;  %v185_v33 = vpop.f32.mrb[5].mxu0  ;;  %246 = vst [vmem:[%s526_s2 + $0x70] sm:$0xff] %v379_v32  ;;  %v217_v34 = vpop.f32.mrb[5].mxu1  ;;  %v275_v45 = vmul.f32 %v371_v30, %v371_v30  ;;  %v283_v5 = vmul.f32 %v379_v32, %v379_v32 }
  0xf3   :  { %236 = vst [vmem:[%s526_s2 + $0x20] sm:$0xff] %v185_v33  ;;  %v251_v35 = vadd.f32 %v250_v31, %v185_v33  ;;  %v273_v36 = vmul.f32 %v185_v33, %v185_v33  ;;  %v287_v37 = vadd.f32 %v286_v29, %v272_v28  ;;  %v372_v38 = vpop.f32.mrb[6].mxu0  ;;  %244 = vst [vmem:[%s526_s2 + $0x60] sm:$0xff] %v217_v34  ;;  %v380_v39 = vpop.f32.mrb[6].mxu1 }
  0xf4   :  { %239 = vst [vmem:[%s526_s2 + $0x38] sm:$0xff] %v372_v38  ;;  %v188_v40 = vpop.f32.mrb[7].mxu0  ;;  %247 = vst [vmem:[%s526_s2 + $0x78] sm:$0xff] %v380_v39  ;;  %v220_v41 = vpop.f32.mrb[7].mxu1  ;;  %v276_v48 = vmul.f32 %v372_v38, %v372_v38  ;;  %v281_v63 = vmul.f32 %v217_v34, %v217_v34  ;;  %v284_v8 = vmul.f32 %v380_v39, %v380_v39 }
  0xf5   :  { %v288_v42 = vadd.f32 %v287_v37, %v273_v36  ;;  %237 = vst [vmem:[%s526_s2 + $0x28] sm:$0xff] %v188_v40  ;;  %v252_v43 = vadd.f32 %v251_v35, %v188_v40  ;;  %v274_v44 = vmul.f32 %v188_v40, %v188_v40  ;;  %245 = vst [vmem:[%s526_s2 + $0x68] sm:$0xff] %v220_v41 }
  0xf6   :  { %v282_v4 = vmul.f32 %v220_v41, %v220_v41 }
  0xf7   :  { %v253_v46 = vadd.f32 %v371_v30, %v252_v43  ;;  %v289_v47 = vadd.f32 %v288_v42, %v274_v44 }
  0xf9   :  { %v290_v49 = vadd.f32 %v289_v47, %v275_v45  ;;  %v254_v50 = vadd.f32 %v372_v38, %v253_v46 }
  0xfb   :  { %v255_v52 = vadd.f32 %v254_v50, %v201_v17  ;;  %v291_v53 = vadd.f32 %v290_v49, %v276_v48 }
  0xfd   :  { %v292_v54 = vadd.f32 %v291_v53, %v277_v51  ;;  %v256_v55 = vadd.f32 %v255_v52, %v204_v21 }
  0xff   :  { %v257_v58 = vadd.f32 %v375_v15, %v256_v55  ;;  %v293_v59 = vadd.f32 %v292_v54, %v278_v56  ;;  %v306_v15 = vlaneseq }
 0x101   :  { %v294_v61 = vadd.f32 %v293_v59, %v279_v57  ;;  %v258_v62 = vadd.f32 %v376_v19, %v257_v58  ;;  %v307_v20 = vshrl.u32 %v306_v15, 7 }
 0x103   :  { %v259_v0 = vadd.f32 %v258_v62, %v217_v34  ;;  %v295_v1 = vadd.f32 %v294_v61, %v280_v60  ;;  %vm309_vm2 = vcmp.eq.s32.totalorder %v307_v20, 1  ;;  %vm308_vm3 = vcmp.eq.s32.totalorder %v307_v20, 0 }
 0x105   :  { %v296_v2 = vadd.f32 %v295_v1, %v281_v63  ;;  %v260_v3 = vadd.f32 %v259_v0, %v220_v41 }
 0x107   :  { %v261_v6 = vadd.f32 %v379_v32, %v260_v3  ;;  %v297_v7 = vadd.f32 %v296_v2, %v282_v4 }
 0x109   :  { %v262_v9 = vadd.f32 %v380_v39, %v261_v6  ;;  %v298_v10 = vadd.f32 %v297_v7, %v283_v5 }
 0x10b   :  { %v263_v11 = vrot.slane %v262_v9, 4  ;;  %v299_v12 = vadd.f32 %v298_v10, %v284_v8 }
 0x10d   :  { %v264_v13 = vadd.f32 %v263_v11, %v262_v9  ;;  %v300_v14 = vrot.slane %v299_v12, 4 }
 0x10f   :  { %v265_v16 = vrot.slane %v264_v13, 2  ;;  %v301_v17 = vadd.f32 %v300_v14, %v299_v12 }
 0x111   :  { %v266_v18 = vadd.f32 %v265_v16, %v264_v13  ;;  %v302_v19 = vrot.slane %v301_v17, 2 }
 0x113   :  { %v303_v21 = vadd.f32 %v302_v19, %v301_v17  ;;  %v267_v22 = vrot.slane %v266_v18, 1 }
 0x115   :  { %v304_v23 = vrot.slane %v303_v21, 1  ;;  %v268_v25 = vadd.f32 %v267_v22, %v266_v18 }
 0x117   :  { %v305_v24 = vadd.f32 %v304_v23, %v303_v21 }
 0x119   :  { %v310_v26 = vsel %vm309_vm2, %v305_v24, 0.0 }
 0x11a   :  { %v311_v27 = vsel %vm308_vm3, %v268_v25, %v310_v26 }
 0x11b   :  { %312 = vst [vmem:[%s527_s3] sm:$0xff] %v311_v27 }

// kernel: downlayer_forward.9
= control target key start
LH: loop header
LB: loop body
LE: loop exit
PB: predicated region body
PF: predicated region fallthrough
CT: control target
= control target key end

     0   :  { %s254_s0 = inlined_call_operand.vmem [shape: f32[128,128], index: 0, kind: input, shape index: {}]   ;;  %s255_s1 = inlined_call_operand.vmem [shape: f32[1,128], index: 1, kind: input, shape index: {}]   ;;  %s256_s2 = inlined_call_operand.vmem [shape: f32[1,128], index: 2, kind: input, shape index: {}]   ;;  %s257_s3 = inlined_call_operand.vmem [shape: f32[128,128], index: 3, kind: output, shape index: {}]  }
   0x1   :  { %v14_v0 = vld [vmem:[%s254_s0] sm:$0xff]  ;;  %v15_v4 = vld [vmem:[%s254_s0 + $0x8] sm:$0xff]  ;;  %v16_v5 = vld [vmem:[%s254_s0 + $0x10] sm:$0xff] }
   0x2   :  { %v112_v1 = vld [vmem:[%s255_s1] ss:$0 sm:$0xff]  ;;  %v17_v6 = vld [vmem:[%s254_s0 + $0x18] sm:$0xff]  ;;  %v19_v11 = vld [vmem:[%s254_s0 + $0x28] sm:$0xff] }
   0x3   :  { %v143_v2 = vld [vmem:[%s256_s2] ss:$0 sm:$0xff]  ;;  %v37_v3 = vmul.f32 %v112_v1, %v14_v0  ;;  %v38_v7 = vmul.f32 %v112_v1, %v15_v4  ;;  %v39_v8 = vmul.f32 %v112_v1, %v16_v5  ;;  %v40_v9 = vmul.f32 %v112_v1, %v17_v6  ;;  %v20_v12 = vld [vmem:[%s254_s0 + $0x30] sm:$0xff]  ;;  %v21_v17 = vld [vmem:[%s254_s0 + $0x38] sm:$0xff] }
   0x4   :  { %v18_v10 = vld [vmem:[%s254_s0 + $0x20] sm:$0xff]  ;;  %v42_v15 = vmul.f32 %v112_v1, %v19_v11  ;;  %v43_v16 = vmul.f32 %v112_v1, %v20_v12  ;;  %v44_v21 = vmul.f32 %v112_v1, %v21_v17  ;;  %v23_v27 = vld [vmem:[%s254_s0 + $0x48] sm:$0xff]  ;;  %v24_v28 = vld [vmem:[%s254_s0 + $0x50] sm:$0xff] }
   0x5   :  { %v60_v13 = vadd.f32 %v143_v2, %v37_v3  ;;  %v41_v14 = vmul.f32 %v112_v1, %v18_v10  ;;  %v61_v18 = vadd.f32 %v143_v2, %v38_v7  ;;  %v62_v19 = vadd.f32 %v143_v2, %v39_v8  ;;  %v22_v22 = vld [vmem:[%s254_s0 + $0x40] sm:$0xff]  ;;  %v25_v29 = vld [vmem:[%s254_s0 + $0x58] sm:$0xff]  ;;  %v27_v35 = vld [vmem:[%s254_s0 + $0x68] sm:$0xff] }
   0x6   :  { %v63_v20 = vadd.f32 %v143_v2, %v40_v9  ;;  %v65_v25 = vadd.f32 %v143_v2, %v42_v15  ;;  %v66_v26 = vadd.f32 %v143_v2, %v43_v16  ;;  %v67_v33 = vadd.f32 %v143_v2, %v44_v21  ;;  %v26_v34 = vld [vmem:[%s254_s0 + $0x60] sm:$0xff]  ;;  %v28_v36 = vld [vmem:[%s254_s0 + $0x70] sm:$0xff]  ;;  %v29_v41 = vld [vmem:[%s254_s0 + $0x78] sm:$0xff] }
   0x7   :  { %v76_v23 = vmax.f32 %v60_v13, 0.0  ;;  %v64_v24 = vadd.f32 %v143_v2, %v41_v14  ;;  %v77_v30 = vmax.f32 %v61_v18, 0.0  ;;  %v78_v31 = vmax.f32 %v62_v19, 0.0 }
   0x8   :  { %v79_v32 = vmax.f32 %v63_v20, 0.0  ;;  %v81_v38 = vmax.f32 %v65_v25, 0.0  ;;  %v82_v39 = vmax.f32 %v66_v26, 0.0  ;;  %v45_v40 = vmul.f32 %v112_v1, %v22_v22 }
   0x9   :  { %92 = vst [vmem:[%s257_s3] sm:$0xff] %v76_v23  ;;  %v80_v37 = vmax.f32 %v64_v24, 0.0  ;;  %93 = vst [vmem:[%s257_s3 + $0x8] sm:$0xff] %v77_v30  ;;  %v83_v42 = vmax.f32 %v67_v33, 0.0  ;;  %v46_v43 = vmul.f32 %v112_v1, %v23_v27  ;;  %v47_v44 = vmul.f32 %v112_v1, %v24_v28 }
   0xa   :  { %94 = vst [vmem:[%s257_s3 + $0x10] sm:$0xff] %v78_v31  ;;  %95 = vst [vmem:[%s257_s3 + $0x18] sm:$0xff] %v79_v32  ;;  %v48_v45 = vmul.f32 %v112_v1, %v25_v29  ;;  %v68_v46 = vadd.f32 %v143_v2, %v45_v40  ;;  %v49_v47 = vmul.f32 %v112_v1, %v26_v34 }
   0xb   :  { %96 = vst [vmem:[%s257_s3 + $0x20] sm:$0xff] %v80_v37  ;;  %97 = vst [vmem:[%s257_s3 + $0x28] sm:$0xff] %v81_v38  ;;  %v50_v48 = vmul.f32 %v112_v1, %v27_v35  ;;  %v51_v49 = vmul.f32 %v112_v1, %v28_v36  ;;  %v69_v50 = vadd.f32 %v143_v2, %v46_v43 }
   0xc   :  { %98 = vst [vmem:[%s257_s3 + $0x30] sm:$0xff] %v82_v39  ;;  %99 = vst [vmem:[%s257_s3 + $0x38] sm:$0xff] %v83_v42  ;;  %v70_v51 = vadd.f32 %v143_v2, %v47_v44  ;;  %v71_v52 = vadd.f32 %v143_v2, %v48_v45  ;;  %v52_v53 = vmul.f32 %v112_v1, %v29_v41  ;;  %v84_v54 = vmax.f32 %v68_v46, 0.0 }
   0xd   :  { %v72_v55 = vadd.f32 %v143_v2, %v49_v47  ;;  %v73_v56 = vadd.f32 %v143_v2, %v50_v48  ;;  %v74_v57 = vadd.f32 %v143_v2, %v51_v49  ;;  %v85_v58 = vmax.f32 %v69_v50, 0.0 }
   0xe   :  { %v86_v59 = vmax.f32 %v70_v51, 0.0  ;;  %v87_v60 = vmax.f32 %v71_v52, 0.0  ;;  %v75_v61 = vadd.f32 %v143_v2, %v52_v53  ;;  %100 = vst [vmem:[%s257_s3 + $0x40] sm:$0xff] %v84_v54 }
   0xf   :  { %v88_v62 = vmax.f32 %v72_v55, 0.0  ;;  %v89_v63 = vmax.f32 %v73_v56, 0.0  ;;  %v90_v0 = vmax.f32 %v74_v57, 0.0  ;;  %101 = vst [vmem:[%s257_s3 + $0x48] sm:$0xff] %v85_v58 }
  0x10   :  { %102 = vst [vmem:[%s257_s3 + $0x50] sm:$0xff] %v86_v59  ;;  %103 = vst [vmem:[%s257_s3 + $0x58] sm:$0xff] %v87_v60  ;;  %v91_v1 = vmax.f32 %v75_v61, 0.0 }
  0x11   :  { %104 = vst [vmem:[%s257_s3 + $0x60] sm:$0xff] %v88_v62  ;;  %105 = vst [vmem:[%s257_s3 + $0x68] sm:$0xff] %v89_v63 }
  0x12   :  { %106 = vst [vmem:[%s257_s3 + $0x70] sm:$0xff] %v90_v0  ;;  %107 = vst [vmem:[%s257_s3 + $0x78] sm:$0xff] %v91_v1 }

</bundles_post_ra>
